<compile_context>
chip_gen: v7x
topology: tpu7x:2x2x1
jax: 0.10.0
libtpu: 0.0.40
codegen_flags: <defaults>
</compile_context>

<pallas_src>
import numpy as np
import jax
import jax.numpy as jnp
from jax.experimental import pallas as pl
from jax.experimental.pallas import tpu as pltpu

# ----------------------------------------------------------------------------
# Model / layout constants
# ----------------------------------------------------------------------------
NUM_CLASSES = 5      # semantic classes
EMB_DIM = 3          # embedding (spatial) dim
HID = 32             # CNN / GNN hidden width
F_GNN = 16           # cfg['full_cnn']['num_gnn_features']
FRAG_SIZE = 8        # points per (synthetic) fragment
LANE = 128           # TPU lane width: all feature axes padded to this
TM_MAX = 512         # row-tile; sized for v7x's 64 MiB VMEM (also fine on v5e/v6e)

# Column layout of the fused CNN head output (lane-padded to 128)
SEG_SL = slice(0, 5)
EMB_SL = slice(5, 8)
SEED_SL = slice(8, 9)
MARGIN_SL = slice(9, 10)
GNNF_SL = slice(10, 10 + F_GNN)


# ----------------------------------------------------------------------------
# Pallas kernels (all operate on [TM, 128] lane-dense tiles, bf16 matmul inputs,
# f32 accumulation + epilogue)
# ----------------------------------------------------------------------------
def _cnn_kernel(x_ref, w1_ref, b1_ref, w2_ref, b2_ref, wh_ref, bh_ref, o_ref):
    """Fused point-wise CNN: relu(x@W1+b1) -> relu(.@W2+b2) -> .@W_heads+b_heads."""
    h = jnp.dot(x_ref[...], w1_ref[...], preferred_element_type=jnp.float32)
    h = jnp.maximum(h + b1_ref[...], 0.0)
    h = jnp.dot(h.astype(jnp.bfloat16), w2_ref[...], preferred_element_type=jnp.float32)
    h = jnp.maximum(h + b2_ref[...], 0.0)
    y = jnp.dot(h.astype(jnp.bfloat16), wh_ref[...], preferred_element_type=jnp.float32)
    o_ref[...] = (y + bh_ref[...]).astype(o_ref.dtype)


def _edge_msg_kernel(xij_ref, l1w_ref, l1b_ref, l2w_ref, l2b_ref,
                     mwj_ref, mwe_ref, mb_ref, e_ref, m_ref):
    """Fused EdgeFeatureNet + message MLP.

    xij lanes: [0:16]=x_i, [16:32]=x_j, rest zero.
    e   = l2(relu(l1(cat(x_i, x_j))))
    msg = relu(W_mj . x_j + W_me . e + b_m)   (weights row-placed so that the
          xij tile and the e tile can be used directly, no lane shuffles)
    """
    xij = xij_ref[...]
    h = jnp.dot(xij, l1w_ref[...], preferred_element_type=jnp.float32)
    h = jnp.maximum(h + l1b_ref[...], 0.0)
    e = jnp.dot(h.astype(jnp.bfloat16), l2w_ref[...], preferred_element_type=jnp.float32)
    e = e + l2b_ref[...]
    e_ref[...] = e.astype(e_ref.dtype)
    m = jnp.dot(xij, mwj_ref[...], preferred_element_type=jnp.float32)
    m = m + jnp.dot(e.astype(jnp.bfloat16), mwe_ref[...], preferred_element_type=jnp.float32)
    m_ref[...] = jnp.maximum(m + mb_ref[...], 0.0).astype(m_ref.dtype)


def _node_kernel(x_ref, agg_ref, ux_ref, ua_ref, ub_ref, npw_ref, npb_ref,
                 xnew_ref, npred_ref):
    """Fused node update MLP (relu(W_x.x + W_a.agg + b)) + node-prediction head."""
    xn = jnp.dot(x_ref[...], ux_ref[...], preferred_element_type=jnp.float32)
    xn = xn + jnp.dot(agg_ref[...], ua_ref[...], preferred_element_type=jnp.float32)
    xn = jnp.maximum(xn + ub_ref[...], 0.0)
    xnew_ref[...] = xn.astype(xnew_ref.dtype)
    npred = jnp.dot(xn.astype(jnp.bfloat16), npw_ref[...], preferred_element_type=jnp.float32)
    npred_ref[...] = (npred + npb_ref[...]).astype(npred_ref.dtype)


def _edge_pred_kernel(xi_ref, xj_ref, e_ref, wi_ref, wj_ref, we_ref, b_ref, o_ref):
    """Edge prediction head on cat(x_i', x_j', e) via row-split weights."""
    y = jnp.dot(xi_ref[...], wi_ref[...], preferred_element_type=jnp.float32)
    y = y + jnp.dot(xj_ref[...], wj_ref[...], preferred_element_type=jnp.float32)
    y = y + jnp.dot(e_ref[...], we_ref[...], preferred_element_type=jnp.float32)
    o_ref[...] = (y + b_ref[...]).astype(o_ref.dtype)


# ----------------------------------------------------------------------------
# Generic row-tiled pallas_call wrapper
# ----------------------------------------------------------------------------
def _round_up(x, m):
    return ((x + m - 1) // m) * m


def _pad_lanes(x):
    d = x.shape[1]
    if d == LANE:
        return x
    return jnp.pad(x, ((0, 0), (0, LANE - d)))


def _tiled(kernel, row_arrays, const_arrays, n_out):
    """Call `kernel` tiled over rows.

    row_arrays:   list of [M, 128] arrays, tiled with BlockSpec((TM,128), i->(i,0))
    const_arrays: weights [128,128] / biases [1,128], resident across grid steps
    returns:      n_out lane-dense [M, 128] float32 arrays
    """
    M = row_arrays[0].shape[0]
    if M == 0:
        return [jnp.zeros((0, LANE), jnp.float32) for _ in range(n_out)]
    tm = min(TM_MAX, _round_up(M, 8))
    Mp = _round_up(M, tm)
    rows = [jnp.pad(a, ((0, Mp - M), (0, 0))) if Mp != M else a for a in row_arrays]
    grid = (Mp // tm,)
    row_spec = pl.BlockSpec((tm, LANE), lambda i: (i, 0))
    in_specs = [row_spec for _ in rows] + \
               [pl.BlockSpec(c.shape, lambda i: (0, 0)) for c in const_arrays]
    out_specs = [pl.BlockSpec((tm, LANE), lambda i: (i, 0)) for _ in range(n_out)]
    out_shape = [jax.ShapeDtypeStruct((Mp, LANE), jnp.float32) for _ in range(n_out)]
    outs = pl.pallas_call(
        kernel,
        grid=grid,
        in_specs=in_specs,
        out_specs=out_specs,
        out_shape=out_shape,
        compiler_params=pltpu.CompilerParams(dimension_semantics=("parallel",)),
    )(*rows, *const_arrays)
    return [o[:M] for o in outs]


# ----------------------------------------------------------------------------
# Parameter construction: weights stored pre-padded [128,128] (bf16) with the
# real block placed at the correct row/col offset; biases f32 [1,128].
# ----------------------------------------------------------------------------
def _pad_w(key, din, dout, row_off=0, col_off=0, scale=0.1):
    w = jnp.zeros((LANE, LANE), jnp.float32)
    w = w.at[row_off:row_off + din, col_off:col_off + dout].set(
        scale * jax.random.normal(key, (din, dout), jnp.float32))
    return w.astype(jnp.bfloat16)


def _pad_b(key, dout, col_off=0, scale=0.1):
    b = jnp.zeros((1, LANE), jnp.float32)
    b = b.at[0, col_off:col_off + dout].set(
        scale * jax.random.normal(key, (dout,), jnp.float32))
    return b


def _pad_wb(key, din, dout, row_off=0, col_off=0, scale=0.1):
    kw, kb = jax.random.split(key)
    return (_pad_w(kw, din, dout, row_off, col_off, scale),
            _pad_b(kb, dout, col_off, scale))


def init_params(seed=42):
    keys = jax.random.split(jax.random.PRNGKey(seed), 64)
    k = iter(keys)
    p = {}

    # Fused FullCNN stand-in: x[4] -> HID -> HID -> concat(seg|emb|seed|margin|gnn_feat)
    w1, b1 = _pad_wb(next(k), 4, HID)
    w2, b2 = _pad_wb(next(k), HID, HID)
    wh = jnp.zeros((LANE, LANE), jnp.float32)
    bh = jnp.zeros((1, LANE), jnp.float32)
    for dout, off in [(NUM_CLASSES, SEG_SL.start), (EMB_DIM, EMB_SL.start),
                      (1, SEED_SL.start), (1, MARGIN_SL.start), (F_GNN, GNNF_SL.start)]:
        kw, kb = jax.random.split(next(k))
        wh = wh.at[0:HID, off:off + dout].set(
            0.1 * jax.random.normal(kw, (HID, dout), jnp.float32))
        bh = bh.at[0, off:off + dout].set(
            0.1 * jax.random.normal(kb, (dout,), jnp.float32))
    p["cnn"] = {"w1": w1, "b1": b1, "w2": w2, "b2": b2,
                "wh": wh.astype(jnp.bfloat16), "bh": bh}

    def edge_net_params():
        l1_w, l1_b = _pad_wb(next(k), 2 * F_GNN, F_GNN)
        l2_w, l2_b = _pad_wb(next(k), F_GNN, F_GNN)
        return {"l1_w": l1_w, "l1_b": l1_b, "l2_w": l2_w, "l2_b": l2_b}

    p["particle_edge_net"] = edge_net_params()
    p["inter_edge_net"] = edge_net_params()

    def gnn_params():
        # TODO(synk): true NNConv applies an edge-conditioned per-edge weight matrix;
        # here messages are MLP(concat(x_j, e)), preserving node/edge output semantics.
        return {
            # message MLP (concat(x_j, e) -> HID), split by input part
            "msg_wj": _pad_w(next(k), F_GNN, HID, row_off=F_GNN),  # x_j at lanes 16:32 of xij
            "msg_we": _pad_w(next(k), F_GNN, HID, row_off=0),      # e at lanes 0:16
            "msg_b": _pad_b(next(k), HID),
            # update MLP (concat(x, agg) -> HID), split by input part
            "upd_wx": _pad_w(next(k), F_GNN, HID),
            "upd_wa": _pad_w(next(k), HID, HID),
            "upd_b": _pad_b(next(k), HID),
            # node prediction head
            "np_w": _pad_w(next(k), HID, 2),
            "np_b": _pad_b(next(k), 2),
            # edge prediction head (concat(x_i', x_j', e) -> 2), split by input part
            "ep_wi": _pad_w(next(k), HID, 2),
            "ep_wj": _pad_w(next(k), HID, 2),
            "ep_we": _pad_w(next(k), F_GNN, 2),
            "ep_b": _pad_b(next(k), 2),
        }

    p["particle_gnn"] = gnn_params()
    p["inter_gnn"] = gnn_params()   # instantiated as in __init__ (the reference forward
                                    # reuses self.particle_gnn for both GNN stages)
    return p


# ----------------------------------------------------------------------------
# Device-side stages (jitted; pallas_calls + small XLA glue, no host syncs)
# ----------------------------------------------------------------------------
@jax.jit
def _stage1(cnn_params, points):
    """Fused point-wise CNN + heads, fragment pooling, fragment semantics."""
    coords = points[:, :3]
    val = points[:, 4:5]
    batch = points[:, 3].astype(jnp.int32)
    feats = jnp.concatenate([coords, val], axis=1)                 # [N, 4]
    x_in = _pad_lanes(feats).astype(jnp.bfloat16)                  # [N, 128]

    heads = _tiled(_cnn_kernel, [x_in],
                   [cnn_params["w1"], cnn_params["b1"],
                    cnn_params["w2"], cnn_params["b2"],
                    cnn_params["wh"], cnn_params["bh"]], n_out=1)[0]   # [N, 128] f32

    segmentation = heads[:, SEG_SL]
    embeddings = heads[:, EMB_SL]
    seediness = heads[:, SEED_SL]
    margins = heads[:, MARGIN_SL]
    features_gnn = heads[:, GNNF_SL]

    semantic_labels = jnp.argmax(segmentation, axis=1)             # inference path

    # --- fragment formation ---------------------------------------------------
    # TODO(synk): fit_predict / gaussian_kernel mean-shift clustering on the
    # embedding space replaced by deterministic fixed-size contiguous chunks.
    N = points.shape[0]
    n_frag = N // FRAG_SIZE
    trimmed = n_frag * FRAG_SIZE
    # mean-pool per fragment via reshape (no dense one-hot matmul)
    node_x = features_gnn[:trimmed].reshape(n_frag, FRAG_SIZE, F_GNN).mean(axis=1)
    # fragment semantic class = majority vote via reshaped one-hot count
    sem_oh = jax.nn.one_hot(semantic_labels[:trimmed], NUM_CLASSES, dtype=jnp.float32)
    class_counts = sem_oh.reshape(n_frag, FRAG_SIZE, NUM_CLASSES).sum(axis=1)
    fragment_seg = jnp.argmax(class_counts, axis=1).astype(jnp.int32)
    frag_batch = batch[:trimmed:FRAG_SIZE]
    return (segmentation, embeddings, seediness, margins, features_gnn,
            node_x, fragment_seg, frag_batch)


@jax.jit
def _gnn_with_edges(x, src, tgt, edge_params, gnn_params):
    """Edge-feature net + message passing + node/edge prediction heads."""
    n = x.shape[0]
    E = src.shape[0]
    xi = x[src]
    xj = x[tgt]
    xij = _pad_lanes(jnp.concatenate([xi, xj], axis=1)).astype(jnp.bfloat16)   # [E, 128]

    e_pad, msg_pad = _tiled(
        _edge_msg_kernel, [xij],
        [edge_params["l1_w"], edge_params["l1_b"],
         edge_params["l2_w"], edge_params["l2_b"],
         gnn_params["msg_wj"], gnn_params["msg_we"], gnn_params["msg_b"]],
        n_out=2)

    # mean-aggregate messages onto target nodes (segment reduction, no dense one-hot)
    agg_sum = jax.ops.segment_sum(msg_pad, src, num_segments=n)
    cnt = jax.ops.segment_sum(jnp.ones((E,), jnp.float32), src, num_segments=n)
    agg = (agg_sum / jnp.maximum(cnt, 1.0)[:, None]).astype(jnp.bfloat16)

    x_pad = _pad_lanes(x).astype(jnp.bfloat16)
    xnew_pad, npred_pad = _tiled(
        _node_kernel, [x_pad, agg],
        [gnn_params["upd_wx"], gnn_params["upd_wa"], gnn_params["upd_b"],
         gnn_params["np_w"], gnn_params["np_b"]],
        n_out=2)

    xni = xnew_pad[src].astype(jnp.bfloat16)
    xnj = xnew_pad[tgt].astype(jnp.bfloat16)
    epred_pad = _tiled(
        _edge_pred_kernel, [xni, xnj, e_pad.astype(jnp.bfloat16)],
        [gnn_params["ep_wi"], gnn_params["ep_wj"], gnn_params["ep_we"],
         gnn_params["ep_b"]],
        n_out=1)[0]

    return npred_pad[:, :2], epred_pad[:, :2]


@jax.jit
def _gnn_no_edges(x, gnn_params):
    n = x.shape[0]
    x_pad = _pad_lanes(x).astype(jnp.bfloat16)
    agg = jnp.zeros((n, LANE), jnp.bfloat16)
    _, npred_pad = _tiled(
        _node_kernel, [x_pad, agg],
        [gnn_params["upd_wx"], gnn_params["upd_wa"], gnn_params["upd_b"],
         gnn_params["np_w"], gnn_params["np_b"]],
        n_out=2)
    return npred_pad[:, :2]


def gnn_stage(x_nodes, edge_index_np, edge_params, gnn_params):
    n = int(x_nodes.shape[0])
    if n == 0:
        return jnp.zeros((0, 2), jnp.float32), jnp.zeros((0, 2), jnp.float32)
    if len(edge_index_np):
        src = jnp.asarray(edge_index_np[:, 0].astype(np.int32))
        tgt = jnp.asarray(edge_index_np[:, 1].astype(np.int32))
        return _gnn_with_edges(x_nodes, src, tgt, edge_params, gnn_params)
    node_pred = _gnn_no_edges(x_nodes, gnn_params)
    return node_pred, jnp.zeros((0, 2), jnp.float32)


def _segment_mean(x, ids, num_segments):
    s = jax.ops.segment_sum(x, ids, num_segments=num_segments)
    c = jax.ops.segment_sum(jnp.ones(ids.shape, jnp.float32), ids,
                            num_segments=num_segments)
    return s / jnp.maximum(c, 1.0)[:, None]


# ----------------------------------------------------------------------------
# Host-side glue helpers
# ----------------------------------------------------------------------------
def complete_edges(batch_np):
    """Directed complete graph within each batch (get_edge_features topology)."""
    edges = []
    for b in np.unique(batch_np):
        idx = np.where(batch_np == b)[0]
        if len(idx) < 2:
            continue
        ii, jj = np.meshgrid(idx, idx, indexing="ij")
        mask = ii != jj
        edges.append(np.stack([ii[mask], jj[mask]], axis=1))
    if not edges:
        return np.zeros((0, 2), np.int32)
    return np.concatenate(edges, axis=0).astype(np.int32)


def union_find_groups(n, edges, edge_pred_np):
    """Replacement for node_assignment_score: connected components over edges
    whose 2-way edge prediction argmax == 1."""
    # TODO(synk): node_assignment_score uses softmax-scored grouping; we use
    # plain union-find on positively-predicted edges instead.
    parent = list(range(n))

    def find(a):
        while parent[a] != a:
            parent[a] = parent[parent[a]]
            a = parent[a]
        return a

    if len(edges):
        keep = np.argmax(edge_pred_np, axis=1) == 1
        for (i, j), on in zip(edges, keep):
            if on:
                ri, rj = find(int(i)), find(int(j))
                if ri != rj:
                    parent[rj] = ri
    roots = np.array([find(i) for i in range(n)])
    _, group = np.unique(roots, return_inverse=True)
    return group.astype(np.int64)


# ----------------------------------------------------------------------------
# FullChain forward (inference path: train_stage = False)
# ----------------------------------------------------------------------------
def full_chain_forward(params, points):
    """points: [N, 5] columns [x, y, z, batch_id, val]"""
    N = points.shape[0]

    # --- 1) Fused FullCNN (UResNet stand-in) + fragment pooling --------------
    # TODO(synk): sparse (MinkowskiEngine) UResNet encoder/decoders replaced by
    # a point-wise MLP; PPN branch omitted.
    (segmentation, embeddings, seediness, margins, features_gnn,
     node_x, fragment_seg, frag_batch) = _stage1(params["cnn"], points)

    result = {
        "segmentation": [segmentation],
        "embeddings": [embeddings],
        "seediness": [seediness],
        "margins": [margins],
        "features_gnn": [features_gnn],
    }

    # single host sync for the data-dependent bookkeeping below
    fragment_seg_np, frag_batch_np, batch_col_np = jax.device_get(
        (fragment_seg, frag_batch, points[:, 3].astype(jnp.int32)))
    fragment_seg_np = np.asarray(fragment_seg_np)
    frag_batch_np = np.asarray(frag_batch_np)
    batch_col_np = np.asarray(batch_col_np)

    n_frag = N // FRAG_SIZE
    # TODO(synk): points beyond n_frag*FRAG_SIZE are dropped from all fragments
    fragments_list = [np.arange(i * FRAG_SIZE, (i + 1) * FRAG_SIZE) for i in range(n_frag)]

    n_batches = len(np.unique(batch_col_np))
    counts_per_batch = [int((batch_col_np == b).sum()) for b in range(n_batches)]
    vids = np.concatenate([np.arange(c) for c in counts_per_batch])

    # --- 2) Particle GNN on EM fragments --------------------------------------
    em_mask = np.where(fragment_seg_np == 0)[0]
    if len(em_mask) < 2:
        em_mask = np.arange(n_frag)   # fallback for synthetic random weights

    x_em = node_x[jnp.asarray(em_mask)]
    batch_em = frag_batch_np[em_mask]
    edge_index_p = complete_edges(batch_em)
    node_pred_all, edge_pred_all = gnn_stage(
        x_em, edge_index_p, params["particle_edge_net"], params["particle_gnn"])

    # host sync: edge predictions are needed for the union-find grouping
    edge_pred_np = np.asarray(jax.device_get(edge_pred_all))

    if len(batch_em):
        cids = np.concatenate([np.arange(c) for c in
                               np.unique(batch_em, return_counts=True)[1]])
    else:
        cids = np.zeros((0,), np.int64)
    bcids = [np.where(batch_em == b)[0] for b in range(n_batches)]
    if len(edge_index_p):
        beids = [np.where(batch_em[edge_index_p[:, 0]] == b)[0] for b in range(n_batches)]
    else:
        beids = [np.array([], dtype=np.int64) for _ in range(n_batches)]

    node_pred = [node_pred_all[jnp.asarray(b)] for b in bcids]
    edge_pred = [edge_pred_all[jnp.asarray(b)] for b in beids]
    edge_index_split = [cids[edge_index_p[b]] if len(b) else np.zeros((0, 2), np.int64)
                        for b in beids]
    frags = [[vids[fragments_list[em_mask[i]]] for i in b] for b in bcids]

    result.update({"fragments": [frags], "frag_node_pred": [node_pred],
                   "frag_edge_pred": [edge_pred], "frag_edge_index": [edge_index_split]})

    # group predictions (inference path)
    group_ids = []
    for b in range(n_batches):
        n_b = len(frags[b])
        if n_b == 0:
            group_ids.append(np.array([], dtype=np.int64))
        else:
            group_ids.append(union_find_groups(n_b, edge_index_split[b],
                                               edge_pred_np[beids[b]]))
    result.update({"frag_group_pred": [group_ids]})

    # --- 3) Interaction GNN on particles ---------------------------------------
    non_em_mask = np.where((fragment_seg_np != 0) & (fragment_seg_np != 4))[0]
    particles = [vids[fragments_list[i]] for i in non_em_mask]
    xp_parts = []
    xpbatch_parts = []
    if len(non_em_mask):
        xp_parts.append(node_x[jnp.asarray(non_em_mask)])
        xpbatch_parts.append(frag_batch_np[non_em_mask].astype(np.int64))

    # batched group-mean features: one global group id per EM fragment, then a
    # single segment-mean on device (no per-group kernel launches)
    gid_em = np.zeros(len(em_mask), np.int32)
    group_batches = []
    g_count = 0
    for b in range(n_batches):
        batch_mask = np.where(batch_em == b)[0]
        gb = group_ids[b]
        for g in np.unique(gb):
            group_mask = np.where(gb == g)[0]
            members = batch_mask[group_mask]
            gid_em[members] = g_count
            members_frag = em_mask[members]
            particles.append(np.concatenate([vids[fragments_list[i]] for i in members_frag]))
            group_batches.append(b)
            g_count += 1

    if g_count:
        group_feats = _segment_mean(x_em, jnp.asarray(gid_em), g_count)
        xp_parts.append(group_feats)
        xpbatch_parts.append(np.array(group_batches, dtype=np.int64))

    if xp_parts:
        xp = jnp.concatenate(xp_parts, axis=0)
        xpbatch_np = np.concatenate(xpbatch_parts)
    else:
        xp = jnp.zeros((0, F_GNN), jnp.float32)
        xpbatch_np = np.zeros((0,), np.int64)

    order = np.argsort(xpbatch_np, kind="stable")
    particles = [particles[i] for i in order]
    if len(order):
        xp = xp[jnp.asarray(order)]
    xpbatch_np = xpbatch_np[order]

    edge_index_i = complete_edges(xpbatch_np)
    # NOTE: reference forward reuses self.particle_gnn for the interaction stage
    _, inter_edge_pred_all = gnn_stage(
        xp, edge_index_i, params["inter_edge_net"], params["particle_gnn"])

    if len(xpbatch_np):
        cids_i = np.concatenate([np.arange(c) for c in
                                 np.unique(xpbatch_np, return_counts=True)[1]])
    else:
        cids_i = np.zeros((0,), np.int64)
    bcids_i = [np.where(xpbatch_np == b)[0] for b in range(n_batches)]
    if len(edge_index_i):
        beids_i = [np.where(xpbatch_np[edge_index_i[:, 0]] == b)[0] for b in range(n_batches)]
    else:
        beids_i = [np.array([], dtype=np.int64) for _ in range(n_batches)]

    inter_edge_pred = [inter_edge_pred_all[jnp.asarray(b)] for b in beids_i]
    inter_edge_index = [cids_i[edge_index_i[b]] if len(b) else np.zeros((0, 2), np.int64)
                        for b in beids_i]
    particles_split = [[particles[i] for i in b] for b in bcids_i]

    result.update({"particles": [particles_split],
                   "inter_edge_pred": [inter_edge_pred],
                   "inter_edge_index": [inter_edge_index]})
    return result


# ----------------------------------------------------------------------------
if __name__ == "__main__":
    params = init_params(seed=42)

    # Input: N x 5 tensor [x, y, z, batch_id, val], 2 batches x 256 points each
    key = jax.random.PRNGKey(0)
    k1, k2 = jax.random.split(key)
    N_PER_BATCH, N_BATCH = 256, 2
    N = N_PER_BATCH * N_BATCH
    coords = 16.0 * jax.random.uniform(k1, (N, 3), jnp.float32)
    vals = jax.random.uniform(k2, (N, 1), jnp.float32)
    batch = jnp.repeat(jnp.arange(N_BATCH, dtype=jnp.float32), N_PER_BATCH)[:, None]
    points = jnp.concatenate([coords, batch, vals], axis=1)      # [512, 5]

    result = full_chain_forward(params, points)

    # block on device results
    jax.block_until_ready(result["segmentation"][0])
    jax.block_until_ready(result["features_gnn"][0])
    for arr in result["frag_node_pred"][0]:
        jax.block_until_ready(arr)
    for arr in result["inter_edge_pred"][0]:
        jax.block_until_ready(arr)

    print("KERNEL_OK")
</pallas_src>

<mosaic_0001>
module attributes {stable_mosaic.version = 11 : i64} {
  func.func @_cnn_kernel(%arg0: i32, %arg1: memref<512x128xbf16, #tpu.memory_space<vmem>>, %arg2: memref<128x128xbf16, #tpu.memory_space<vmem>>, %arg3: memref<1x128xf32, #tpu.memory_space<vmem>>, %arg4: memref<128x128xbf16, #tpu.memory_space<vmem>>, %arg5: memref<1x128xf32, #tpu.memory_space<vmem>>, %arg6: memref<128x128xbf16, #tpu.memory_space<vmem>>, %arg7: memref<1x128xf32, #tpu.memory_space<vmem>>, %arg8: memref<512x128xf32, #tpu.memory_space<vmem>>) attributes {dimension_semantics = [#tpu.dimension_semantics<parallel>], iteration_bounds = array<i64: 1>, scalar_prefetch = 0 : i64, scratch_operands = 0 : i64, tpu.core_type = #tpu.core_type<tc>, window_params = [{transform_indices = @transform_0, window_bounds = array<i64: 512, 128>}, {pipeline_mode = #tpu.pipeline_mode<synchronous>, transform_indices = @transform_1, window_bounds = array<i64: 128, 128>}, {pipeline_mode = #tpu.pipeline_mode<synchronous>, transform_indices = @transform_2, window_bounds = array<i64: 1, 128>}, {pipeline_mode = #tpu.pipeline_mode<synchronous>, transform_indices = @transform_3, window_bounds = array<i64: 128, 128>}, {pipeline_mode = #tpu.pipeline_mode<synchronous>, transform_indices = @transform_4, window_bounds = array<i64: 1, 128>}, {pipeline_mode = #tpu.pipeline_mode<synchronous>, transform_indices = @transform_5, window_bounds = array<i64: 128, 128>}, {pipeline_mode = #tpu.pipeline_mode<synchronous>, transform_indices = @transform_6, window_bounds = array<i64: 1, 128>}, {transform_indices = @transform_7, window_bounds = array<i64: 512, 128>}]} {
    %c0 = arith.constant 0 : index
    %c0_0 = arith.constant 0 : index
    %0 = vector.load %arg1[%c0, %c0_0] : memref<512x128xbf16, #tpu.memory_space<vmem>>, vector<512x128xbf16>
    %c0_1 = arith.constant 0 : index
    %c0_2 = arith.constant 0 : index
    %1 = vector.load %arg2[%c0_1, %c0_2] : memref<128x128xbf16, #tpu.memory_space<vmem>>, vector<128x128xbf16>
    %cst = arith.constant dense<0.000000e+00> : vector<512x128xf32>
    %2 = tpu.matmul %0, %1, %cst {dimension_numbers = #tpu.dot_dimension_numbers<[1], [0], [0], [1], [0, 0, 1, 1], [], []>} : vector<512x128xbf16>, vector<128x128xbf16>, vector<512x128xf32> -> vector<512x128xf32>
    %c0_3 = arith.constant 0 : index
    %c0_4 = arith.constant 0 : index
    %3 = vector.load %arg3[%c0_3, %c0_4] : memref<1x128xf32, #tpu.memory_space<vmem>>, vector<1x128xf32>
    %4 = vector.broadcast %3 : vector<1x128xf32> to vector<512x128xf32>
    %5 = arith.addf %2, %4 : vector<512x128xf32>
    %cst_5 = arith.constant 0.000000e+00 : f32
    %6 = vector.broadcast %cst_5 : f32 to vector<512x128xf32>
    %7 = arith.maximumf %5, %6 : vector<512x128xf32>
    %8 = arith.truncf %7 : vector<512x128xf32> to vector<512x128xbf16>
    %c0_6 = arith.constant 0 : index
    %c0_7 = arith.constant 0 : index
    %9 = vector.load %arg4[%c0_6, %c0_7] : memref<128x128xbf16, #tpu.memory_space<vmem>>, vector<128x128xbf16>
    %cst_8 = arith.constant dense<0.000000e+00> : vector<512x128xf32>
    %10 = tpu.matmul %8, %9, %cst_8 {dimension_numbers = #tpu.dot_dimension_numbers<[1], [0], [0], [1], [0, 0, 1, 1], [], []>} : vector<512x128xbf16>, vector<128x128xbf16>, vector<512x128xf32> -> vector<512x128xf32>
    %c0_9 = arith.constant 0 : index
    %c0_10 = arith.constant 0 : index
    %11 = vector.load %arg5[%c0_9, %c0_10] : memref<1x128xf32, #tpu.memory_space<vmem>>, vector<1x128xf32>
    %12 = vector.broadcast %11 : vector<1x128xf32> to vector<512x128xf32>
    %13 = arith.addf %10, %12 : vector<512x128xf32>
    %cst_11 = arith.constant 0.000000e+00 : f32
    %14 = vector.broadcast %cst_11 : f32 to vector<512x128xf32>
    %15 = arith.maximumf %13, %14 : vector<512x128xf32>
    %16 = arith.truncf %15 : vector<512x128xf32> to vector<512x128xbf16>
    %c0_12 = arith.constant 0 : index
    %c0_13 = arith.constant 0 : index
    %17 = vector.load %arg6[%c0_12, %c0_13] : memref<128x128xbf16, #tpu.memory_space<vmem>>, vector<128x128xbf16>
    %cst_14 = arith.constant dense<0.000000e+00> : vector<512x128xf32>
    %18 = tpu.matmul %16, %17, %cst_14 {dimension_numbers = #tpu.dot_dimension_numbers<[1], [0], [0], [1], [0, 0, 1, 1], [], []>} : vector<512x128xbf16>, vector<128x128xbf16>, vector<512x128xf32> -> vector<512x128xf32>
    %c0_15 = arith.constant 0 : index
    %c0_16 = arith.constant 0 : index
    %19 = vector.load %arg7[%c0_15, %c0_16] : memref<1x128xf32, #tpu.memory_space<vmem>>, vector<1x128xf32>
    %20 = vector.broadcast %19 : vector<1x128xf32> to vector<512x128xf32>
    %21 = arith.addf %18, %20 : vector<512x128xf32>
    %c0_17 = arith.constant 0 : index
    %c0_18 = arith.constant 0 : index
    %22 = vector.load %arg8[%c0_17, %c0_18] : memref<512x128xf32, #tpu.memory_space<vmem>>, vector<512x128xf32>
    tpu.vector_store %arg8[%c0_17, %c0_18], %21 {strides = array<i32>} : memref<512x128xf32, #tpu.memory_space<vmem>>, vector<512x128xf32>,
    return
  }
  func.func @transform_0(%arg0: i32) -> (i32, i32) {
    %c0_i32 = arith.constant 0 : i32
    %c0_i32_0 = arith.constant 0 : i32
    return %arg0, %c0_i32 : i32, i32
  }
  func.func @transform_1(%arg0: i32) -> (i32, i32) {
    %c0_i32 = arith.constant 0 : i32
    %c0_i32_0 = arith.constant 0 : i32
    %c0_i32_1 = arith.constant 0 : i32
    return %c0_i32, %c0_i32_0 : i32, i32
  }
  func.func @transform_2(%arg0: i32) -> (i32, i32) {
    %c0_i32 = arith.constant 0 : i32
    %c0_i32_0 = arith.constant 0 : i32
    %c0_i32_1 = arith.constant 0 : i32
    return %c0_i32, %c0_i32_0 : i32, i32
  }
  func.func @transform_3(%arg0: i32) -> (i32, i32) {
    %c0_i32 = arith.constant 0 : i32
    %c0_i32_0 = arith.constant 0 : i32
    %c0_i32_1 = arith.constant 0 : i32
    return %c0_i32, %c0_i32_0 : i32, i32
  }
  func.func @transform_4(%arg0: i32) -> (i32, i32) {
    %c0_i32 = arith.constant 0 : i32
    %c0_i32_0 = arith.constant 0 : i32
    %c0_i32_1 = arith.constant 0 : i32
    return %c0_i32, %c0_i32_0 : i32, i32
  }
  func.func @transform_5(%arg0: i32) -> (i32, i32) {
    %c0_i32 = arith.constant 0 : i32
    %c0_i32_0 = arith.constant 0 : i32
    %c0_i32_1 = arith.constant 0 : i32
    return %c0_i32, %c0_i32_0 : i32, i32
  }
  func.func @transform_6(%arg0: i32) -> (i32, i32) {
    %c0_i32 = arith.constant 0 : i32
    %c0_i32_0 = arith.constant 0 : i32
    %c0_i32_1 = arith.constant 0 : i32
    return %c0_i32, %c0_i32_0 : i32, i32
  }
  func.func @transform_7(%arg0: i32) -> (i32, i32) {
    %c0_i32 = arith.constant 0 : i32
    %c0_i32_0 = arith.constant 0 : i32
    return %arg0, %c0_i32 : i32, i32
  }
}

</mosaic_0001>

<bundles_post_ra>
// kernel: _stage1.1
= control target key start
LH: loop header
LB: loop body
LE: loop exit
PB: predicated region body
PF: predicated region fallthrough
CT: control target
= control target key end

     0   :  { %s2757_s1 = inlined_call_operand.vmem [shape: bf16[128,128], index: 1, kind: input, shape index: {}]   ;;  %s2758_s0 = inlined_call_operand.vmem [shape: bf16[512,128], index: 0, kind: input, shape index: {}]   ;;  %s2759_s3 = inlined_call_operand.vmem [shape: bf16[128,128], index: 3, kind: input, shape index: {}]   ;;  %s2760_s2 = inlined_call_operand.vmem [shape: f32[1,128], index: 2, kind: input, shape index: {}]   ;;  %s2761_s5 = inlined_call_operand.vmem [shape: bf16[128,128], index: 5, kind: input, shape index: {}]   ;;  %s2762_s4 = inlined_call_operand.vmem [shape: f32[1,128], index: 4, kind: input, shape index: {}]   ;;  %s2763_s6 = inlined_call_operand.vmem [shape: f32[1,128], index: 6, kind: input, shape index: {}]   ;;  %s2764_s7 = inlined_call_operand.vmem [shape: f32[512,128], index: 7, kind: output, shape index: {}]  }
   0x1   :  { %v2058_v0 = vld [vmem:[%s2757_s1] sm:$0xff]   ;;  %v2059_v1 = vld [vmem:[%s2757_s1 + $0x8] sm:$0xff]   ;;  %v2060_v2 = vld [vmem:[%s2757_s1 + $0x10] sm:$0xff]  }
   0x2   :  { %1802 = vmatprep.subr.bf16.mxu0 %v2058_v0  ;;  %2042 = vmatprep.subr.bf16.mxu1 %v2058_v0  ;;  %v2061_v3 = vld [vmem:[%s2757_s1 + $0x18] sm:$0xff]   ;;  %v2066_v4 = vld [vmem:[%s2758_s0] sm:$0xff]   ;;  %v2063_v6 = vld [vmem:[%s2757_s1 + $0x28] sm:$0xff]  }
   0x3   :  { %1803 = vmatpush3.bf16.msra.mxu0 %v2058_v0  ;;  %2050 = vmatpush3.bf16.msra.mxu1 %v2058_v0  ;;  %v2062_v5 = vld [vmem:[%s2757_s1 + $0x20] sm:$0xff]   ;;  %v2064_v7 = vld [vmem:[%s2757_s1 + $0x30] sm:$0xff]   ;;  %v2065_v8 = vld [vmem:[%s2757_s1 + $0x38] sm:$0xff]  }
   0x4   :  { %1804 = vmatprep.subr.bf16.mxu0 %v2059_v1  ;;  %2043 = vmatprep.subr.bf16.mxu1 %v2059_v1  ;;  %v2082_v9 = vld [vmem:[%s2758_s0 + $0x80] sm:$0xff]   ;;  %v2067_v10 = vld [vmem:[%s2758_s0 + $0x8] sm:$0xff]   ;;  %v2068_v11 = vld [vmem:[%s2758_s0 + $0x10] sm:$0xff]  }
   0x5   :  { %1818 = vmatprep.mubr.bf16.mxu0 %v2066_v4  ;;  %1850 = vmatprep.mubr.bf16.mxu1 %v2082_v9  ;;  %v2083_v12 = vld [vmem:[%s2758_s0 + $0x88] sm:$0xff]   ;;  %v2084_v13 = vld [vmem:[%s2758_s0 + $0x90] sm:$0xff]   ;;  %v2069_v14 = vld [vmem:[%s2758_s0 + $0x18] sm:$0xff]  }
   0x6   :  { %v2070_v15 = vld [vmem:[%s2758_s0 + $0x20] sm:$0xff]   ;;  %v2085_v16 = vld [vmem:[%s2758_s0 + $0x98] sm:$0xff]   ;;  %v2099_v19 = vld [vmem:[%s2759_s3 + $0x8] sm:$0xff]  }
   0x7   :  { %1805 = vmatpush3.bf16.msra.mxu0 %v2059_v1  ;;  %2051 = vmatpush3.bf16.msra.mxu1 %v2059_v1  ;;  %v2086_v17 = vld [vmem:[%s2758_s0 + $0xa0] sm:$0xff]   ;;  %v2071_v20 = vld [vmem:[%s2758_s0 + $0x28] sm:$0xff]   ;;  %v2072_v21 = vld [vmem:[%s2758_s0 + $0x30] sm:$0xff]  }
   0x8   :  { %1806 = vmatprep.subr.bf16.mxu0 %v2060_v2  ;;  %2044 = vmatprep.subr.bf16.mxu1 %v2060_v2  ;;  %v2098_v18 = vld [vmem:[%s2759_s3] sm:$0xff]   ;;  %v2087_v22 = vld [vmem:[%s2758_s0 + $0xa8] sm:$0xff]   ;;  %v2088_v23 = vld [vmem:[%s2758_s0 + $0xb0] sm:$0xff]  }
   0x9   :  { %v2100_v24 = vld [vmem:[%s2759_s3 + $0x10] sm:$0xff]   ;;  %v2101_v25 = vld [vmem:[%s2759_s3 + $0x18] sm:$0xff]   ;;  %v2074_v28 = vld [vmem:[%s2758_s0 + $0x40] sm:$0xff]  }
   0xa   :  { %v2073_v26 = vld [vmem:[%s2758_s0 + $0x38] sm:$0xff]   ;;  %v2090_v29 = vld [vmem:[%s2758_s0 + $0xc0] sm:$0xff]   ;;  %v2103_v31 = vld [vmem:[%s2759_s3 + $0x28] sm:$0xff]  }
   0xb   :  { %1807 = vmatpush3.bf16.msra.mxu0 %v2060_v2  ;;  %2052 = vmatpush3.bf16.msra.mxu1 %v2060_v2  ;;  %v2089_v27 = vld [vmem:[%s2758_s0 + $0xb8] sm:$0xff]   ;;  %v2102_v30 = vld [vmem:[%s2759_s3 + $0x20] sm:$0xff]   ;;  %v2075_v32 = vld [vmem:[%s2758_s0 + $0x48] sm:$0xff]  }
   0xc   :  { %1808 = vmatprep.subr.bf16.mxu0 %v2061_v3  ;;  %2045 = vmatprep.subr.bf16.mxu1 %v2061_v3  ;;  %v2091_v33 = vld [vmem:[%s2758_s0 + $0xc8] sm:$0xff]   ;;  %v2076_v34 = vld [vmem:[%s2758_s0 + $0x50] sm:$0xff]   ;;  %v2077_v37 = vld [vmem:[%s2758_s0 + $0x58] sm:$0xff]  }
   0xd   :  { %v2092_v35 = vld [vmem:[%s2758_s0 + $0xd0] sm:$0xff]   ;;  %v2093_v38 = vld [vmem:[%s2758_s0 + $0xd8] sm:$0xff]   ;;  %v2078_v39 = vld [vmem:[%s2758_s0 + $0x60] sm:$0xff]  }
   0xe   :  { %v2104_v36 = vld [vmem:[%s2759_s3 + $0x30] sm:$0xff]   ;;  %v2094_v40 = vld [vmem:[%s2758_s0 + $0xe0] sm:$0xff]   ;;  %v2079_v41 = vld [vmem:[%s2758_s0 + $0x68] sm:$0xff]  }
   0xf   :  { %1809 = vmatpush3.bf16.msra.mxu0 %v2061_v3  ;;  %2053 = vmatpush3.bf16.msra.mxu1 %v2061_v3  ;;  %v2095_v42 = vld [vmem:[%s2758_s0 + $0xe8] sm:$0xff]   ;;  %v2080_v43 = vld [vmem:[%s2758_s0 + $0x70] sm:$0xff]   ;;  %v2081_v45 = vld [vmem:[%s2758_s0 + $0x78] sm:$0xff]  }
  0x10   :  { %1810 = vmatprep.subr.bf16.mxu0 %v2062_v5  ;;  %2046 = vmatprep.subr.bf16.mxu1 %v2062_v5  ;;  %v2096_v44 = vld [vmem:[%s2758_s0 + $0xf0] sm:$0xff]   ;;  %v2097_v46 = vld [vmem:[%s2758_s0 + $0xf8] sm:$0xff]   ;;  %v2301_v48 = vld [vmem:[%s2760_s2] ss:$0 sm:$0xff] }
  0x11   :  { %v2105_v47 = vld [vmem:[%s2759_s3 + $0x38] sm:$0xff]  }
  0x13   :  { %1811 = vmatpush3.bf16.msra.mxu0 %v2062_v5  ;;  %2054 = vmatpush3.bf16.msra.mxu1 %v2062_v5 }
  0x14   :  { %1812 = vmatprep.subr.bf16.mxu0 %v2063_v6  ;;  %2047 = vmatprep.subr.bf16.mxu1 %v2063_v6 }
  0x17   :  { %1813 = vmatpush3.bf16.msra.mxu0 %v2063_v6  ;;  %2055 = vmatpush3.bf16.msra.mxu1 %v2063_v6 }
  0x18   :  { %1814 = vmatprep.subr.bf16.mxu0 %v2064_v7  ;;  %2048 = vmatprep.subr.bf16.mxu1 %v2064_v7 }
  0x1b   :  { %1815 = vmatpush3.bf16.msra.mxu0 %v2064_v7  ;;  %2056 = vmatpush3.bf16.msra.mxu1 %v2064_v7  ;;  %v2106_v7 = vld [vmem:[%s2761_s5] sm:$0xff]  }
  0x1c   :  { %1816 = vmatprep.subr.bf16.mxu0 %v2065_v8  ;;  %2049 = vmatprep.subr.bf16.mxu1 %v2065_v8 }
  0x1f   :  { %1817 = vmatpush3.bf16.msra.mxu0 %v2065_v8  ;;  %2057 = vmatpush3.bf16.msra.mxu1 %v2065_v8  ;;  %v2107_v8 = vld [vmem:[%s2761_s5 + $0x8] sm:$0xff]  }
  0x20   :  { %1882 = vmatprep.subr.bf16.mxu1 %v2098_v18  ;;  %1962 = vmatprep.subr.bf16.mxu0 %v2106_v7 }
  0x22   :  { %1819 = vmatmul.mubr.bf16.vlgmr.msra.gmra.mrb[0].mxu0 %v2067_v10  ;;  %1851 = vmatmul.mubr.bf16.vlgmr.msra.gmra.mrb[0].mxu1 %v2083_v12 }
  0x23   :  { %1822 = vmatprep.mubr.bf16.mxu0 %v2068_v11  ;;  %1854 = vmatprep.mubr.bf16.mxu1 %v2084_v13 }
  0x24   :  { %1883 = vmatpush3.bf16.msra.mxu1 %v2098_v18  ;;  %1963 = vmatpush3.bf16.msra.mxu0 %v2106_v7 }
  0x25   :  { %1884 = vmatprep.subr.bf16.mxu1 %v2099_v19  ;;  %1964 = vmatprep.subr.bf16.mxu0 %v2107_v8 }
  0x28   :  { %1885 = vmatpush3.bf16.msra.mxu1 %v2099_v19  ;;  %1965 = vmatpush3.bf16.msra.mxu0 %v2107_v8 }
  0x29   :  { %1886 = vmatprep.subr.bf16.mxu1 %v2100_v24 }
  0x2a   :  { %1823 = vmatmul.mubr.bf16.gmra.mrb[4].mxu0 %v2069_v14  ;;  %1855 = vmatmul.mubr.bf16.gmra.mrb[4].mxu1 %v2085_v16 }
  0x2b   :  { %1826 = vmatprep.mubr.bf16.mxu0 %v2070_v15  ;;  %1858 = vmatprep.mubr.bf16.mxu1 %v2086_v17  ;;  %v2108_v17 = vld [vmem:[%s2761_s5 + $0x10] sm:$0xff]  }
  0x2c   :  { %1887 = vmatpush3.bf16.msra.mxu1 %v2100_v24  ;;  %1966 = vmatprep.subr.bf16.mxu0 %v2108_v17 }
  0x2d   :  { %1888 = vmatprep.subr.bf16.mxu1 %v2101_v25  ;;  %1967 = vmatpush3.bf16.msra.mxu0 %v2108_v17 }
  0x30   :  { %1889 = vmatpush3.bf16.msra.mxu1 %v2101_v25 }
  0x31   :  { %1890 = vmatprep.subr.bf16.mxu1 %v2102_v30 }
  0x32   :  { %1827 = vmatmul.mubr.bf16.gmra.mrb[8].mxu0 %v2071_v20  ;;  %1859 = vmatmul.mubr.bf16.gmra.mrb[8].mxu1 %v2087_v22 }
  0x33   :  { %1830 = vmatprep.mubr.bf16.mxu0 %v2072_v21  ;;  %1862 = vmatprep.mubr.bf16.mxu1 %v2088_v23 }
  0x34   :  { %1891 = vmatpush3.bf16.msra.mxu1 %v2102_v30 }
  0x35   :  { %1892 = vmatprep.subr.bf16.mxu1 %v2103_v31 }
  0x38   :  { %1893 = vmatpush3.bf16.msra.mxu1 %v2103_v31  ;;  %v2109_v31 = vld [vmem:[%s2761_s5 + $0x18] sm:$0xff]  }
  0x39   :  { %1894 = vmatprep.subr.bf16.mxu1 %v2104_v36  ;;  %1968 = vmatprep.subr.bf16.mxu0 %v2109_v31 }
  0x3a   :  { %1831 = vmatmul.mubr.bf16.gmra.mrb[12].mxu0 %v2073_v26  ;;  %1863 = vmatmul.mubr.bf16.gmra.mrb[12].mxu1 %v2089_v27 }
  0x3b   :  { %1834 = vmatprep.mubr.bf16.mxu0 %v2074_v28  ;;  %1866 = vmatprep.mubr.bf16.mxu1 %v2090_v29 }
  0x3c   :  { %1895 = vmatpush3.bf16.msra.mxu1 %v2104_v36  ;;  %1969 = vmatpush3.bf16.msra.mxu0 %v2109_v31 }
  0x3d   :  { %1896 = vmatprep.subr.bf16.mxu1 %v2105_v47 }
  0x40   :  { %1897 = vmatpush3.bf16.msra.mxu1 %v2105_v47 }
  0x42   :  { %1835 = vmatmul.mubr.bf16.gmra.mrb[16].mxu0 %v2075_v32  ;;  %1867 = vmatmul.mubr.bf16.gmra.mrb[16].mxu1 %v2091_v33 }
  0x43   :  { %1838 = vmatprep.mubr.bf16.mxu0 %v2076_v34  ;;  %1870 = vmatprep.mubr.bf16.mxu1 %v2092_v35 }
  0x4a   :  { %1839 = vmatmul.mubr.bf16.gmra.mrb[20].mxu0 %v2077_v37  ;;  %1871 = vmatmul.mubr.bf16.gmra.mrb[20].mxu1 %v2093_v38 }
  0x4b   :  { %1842 = vmatprep.mubr.bf16.mxu0 %v2078_v39  ;;  %1874 = vmatprep.mubr.bf16.mxu1 %v2094_v40 }
  0x52   :  { %1843 = vmatmul.mubr.bf16.gmra.mrb[24].mxu0 %v2079_v41  ;;  %1875 = vmatmul.mubr.bf16.gmra.mrb[24].mxu1 %v2095_v42 }
  0x53   :  { %1846 = vmatprep.mubr.bf16.mxu0 %v2080_v43  ;;  %1878 = vmatprep.mubr.bf16.mxu1 %v2096_v44 }
  0x5a   :  { %1847 = vmatmul.mubr.bf16.gmra.mrb[28].mxu0 %v2081_v45  ;;  %1879 = vmatmul.mubr.bf16.gmra.mrb[28].mxu1 %v2097_v46 }
  0xf5   :  { %v1820_v49 = vpop.f32.mrb[0].mxu0  ;;  %v1852_v50 = vpop.f32.mrb[0].mxu1 }
  0xf6   :  { %v397_v51 = vadd.f32 %v1820_v49, %v2301_v48  ;;  %v388_v52 = vpop.f32.mrb[1].mxu0  ;;  %v525_v53 = vadd.f32 %v1852_v50, %v2301_v48  ;;  %v516_v54 = vpop.f32.mrb[1].mxu1 }
  0xf7   :  { %v389_v55 = vadd.f32 %v2301_v48, %v388_v52  ;;  %v1821_v56 = vpop.f32.mrb[2].mxu0  ;;  %v517_v57 = vadd.f32 %v2301_v48, %v516_v54  ;;  %v1853_v58 = vpop.f32.mrb[2].mxu1  ;;  %v2110_v52 = vld [vmem:[%s2761_s5 + $0x20] sm:$0xff]  }
  0xf8   :  { %v645_v59 = vmax.f32 %v397_v51, 0.0  ;;  %v400_v60 = vadd.f32 %v1821_v56, %v2301_v48  ;;  %v391_v61 = vpop.f32.mrb[3].mxu0  ;;  %v677_v62 = vmax.f32 %v525_v53, 0.0  ;;  %v528_v63 = vadd.f32 %v1853_v58, %v2301_v48  ;;  %v519_v0 = vpop.f32.mrb[3].mxu1  ;;  %1970 = vmatprep.subr.bf16.mxu0 %v2110_v52 }
  0xf9   :  { %v643_v1 = vmax.f32 %v389_v55, 0.0  ;;  %v392_v2 = vadd.f32 %v2301_v48, %v391_v61  ;;  %v675_v3 = vmax.f32 %v517_v57, 0.0  ;;  %v520_v4 = vadd.f32 %v2301_v48, %v519_v0  ;;  %1971 = vmatpush3.bf16.msra.mxu0 %v2110_v52 }
  0xfa   :  { %v646_v5 = vmax.f32 %v400_v60, 0.0  ;;  %v678_v6 = vmax.f32 %v528_v63, 0.0 }
  0xfb   :  { %v644_v9 = vmax.f32 %v392_v2, 0.0  ;;  %v676_v10 = vmax.f32 %v520_v4, 0.0  ;;  %v2111_v4 = vld [vmem:[%s2761_s5 + $0x28] sm:$0xff]  }
  0xfc   :  { %v708_v11 = vpack.c.bf16 %v646_v5, %v645_v59  ;;  %v2317_v12 = vpack.c.bf16 %v678_v6, %v677_v62  ;;  %1972 = vmatprep.subr.bf16.mxu0 %v2111_v4 }
  0xfd   :  { %v707_v13 = vpack.c.bf16 %v644_v9, %v643_v1  ;;  %v1824_v14 = vpop.f32.mrb[4].mxu0  ;;  %v2319_v15 = vpack.c.bf16 %v676_v10, %v675_v3  ;;  %v1856_v16 = vpop.f32.mrb[4].mxu1  ;;  %1973 = vmatpush3.bf16.msra.mxu0 %v2111_v4 }
  0xfe   :  { %v413_v18 = vadd.f32 %v1824_v14, %v2301_v48  ;;  %v404_v19 = vpop.f32.mrb[5].mxu0  ;;  %v541_v20 = vadd.f32 %v1856_v16, %v2301_v48  ;;  %v532_v21 = vpop.f32.mrb[5].mxu1 }
  0xff   :  { %v405_v22 = vadd.f32 %v2301_v48, %v404_v19  ;;  %v1825_v23 = vpop.f32.mrb[6].mxu0  ;;  %1898 = vmatprep.mubr.bf16.mxu1 %v707_v13  ;;  %v533_v24 = vadd.f32 %v2301_v48, %v532_v21  ;;  %v1857_v25 = vpop.f32.mrb[6].mxu1 }
 0x100   :  { %v416_v26 = vadd.f32 %v1825_v23, %v2301_v48  ;;  %v407_v27 = vpop.f32.mrb[7].mxu0  ;;  %1899 = vmatmul.mubr.bf16.vlgmr.msra.gmra.mrb[32].mxu1 %v708_v11  ;;  %v681_v28 = vmax.f32 %v541_v20, 0.0  ;;  %v544_v29 = vadd.f32 %v1857_v25, %v2301_v48  ;;  %v535_v30 = vpop.f32.mrb[7].mxu1  ;;  %v649_v32 = vmax.f32 %v413_v18, 0.0  ;;  %v2112_v20 = vld [vmem:[%s2761_s5 + $0x30] sm:$0xff]  }
 0x101   :  { %v408_v33 = vadd.f32 %v2301_v48, %v407_v27  ;;  %v679_v34 = vmax.f32 %v533_v24, 0.0  ;;  %v536_v35 = vadd.f32 %v2301_v48, %v535_v30  ;;  %v647_v38 = vmax.f32 %v405_v22, 0.0  ;;  %1974 = vmatprep.subr.bf16.mxu0 %v2112_v20 }
 0x102   :  { %v650_v36 = vmax.f32 %v416_v26, 0.0  ;;  %v682_v37 = vmax.f32 %v544_v29, 0.0  ;;  %1975 = vmatpush3.bf16.msra.mxu0 %v2112_v20 }
 0x103   :  { %v648_v39 = vmax.f32 %v408_v33, 0.0  ;;  %v680_v40 = vmax.f32 %v536_v35, 0.0 }
 0x104   :  { %v710_v41 = vpack.c.bf16 %v650_v36, %v649_v32  ;;  %v2335_v42 = vpack.c.bf16 %v682_v37, %v681_v28 }
 0x105   :  { %v709_v43 = vpack.c.bf16 %v648_v39, %v647_v38  ;;  %v1828_v44 = vpop.f32.mrb[8].mxu0  ;;  %v2337_v45 = vpack.c.bf16 %v680_v40, %v679_v34  ;;  %v1860_v46 = vpop.f32.mrb[8].mxu1 }
 0x106   :  { %v429_v47 = vadd.f32 %v1828_v44, %v2301_v48  ;;  %v420_v49 = vpop.f32.mrb[9].mxu0  ;;  %v557_v50 = vadd.f32 %v1860_v46, %v2301_v48  ;;  %v548_v51 = vpop.f32.mrb[9].mxu1 }
 0x107   :  { %v421_v53 = vadd.f32 %v2301_v48, %v420_v49  ;;  %v1829_v54 = vpop.f32.mrb[10].mxu0  ;;  %1902 = vmatprep.mubr.bf16.mxu1 %v709_v43  ;;  %v549_v55 = vadd.f32 %v2301_v48, %v548_v51  ;;  %v1861_v56 = vpop.f32.mrb[10].mxu1 }
 0x108   :  { %v432_v57 = vadd.f32 %v1829_v54, %v2301_v48  ;;  %v423_v58 = vpop.f32.mrb[11].mxu0  ;;  %1903 = vmatmul.mubr.bf16.gmra.mrb[36].mxu1 %v710_v41  ;;  %v685_v59 = vmax.f32 %v557_v50, 0.0  ;;  %v560_v60 = vadd.f32 %v1861_v56, %v2301_v48  ;;  %v551_v61 = vpop.f32.mrb[11].mxu1  ;;  %v653_v1 = vmax.f32 %v429_v47, 0.0 }
 0x109   :  { %v424_v62 = vadd.f32 %v2301_v48, %v423_v58  ;;  %v683_v63 = vmax.f32 %v549_v55, 0.0  ;;  %v552_v0 = vadd.f32 %v2301_v48, %v551_v61  ;;  %v651_v5 = vmax.f32 %v421_v53, 0.0 }
 0x10a   :  { %v654_v2 = vmax.f32 %v432_v57, 0.0  ;;  %v686_v3 = vmax.f32 %v560_v60, 0.0 }
 0x10b   :  { %v652_v6 = vmax.f32 %v424_v62, 0.0  ;;  %v684_v7 = vmax.f32 %v552_v0, 0.0 }
 0x10c   :  { %v712_v8 = vpack.c.bf16 %v654_v2, %v653_v1  ;;  %v2353_v9 = vpack.c.bf16 %v686_v3, %v685_v59 }
 0x10d   :  { %v711_v10 = vpack.c.bf16 %v652_v6, %v651_v5  ;;  %v1832_v11 = vpop.f32.mrb[12].mxu0  ;;  %v2355_v13 = vpack.c.bf16 %v684_v7, %v683_v63  ;;  %v1864_v14 = vpop.f32.mrb[12].mxu1 }
 0x10e   :  { %v445_v16 = vadd.f32 %v1832_v11, %v2301_v48  ;;  %v436_v17 = vpop.f32.mrb[13].mxu0  ;;  %v573_v18 = vadd.f32 %v1864_v14, %v2301_v48  ;;  %v564_v19 = vpop.f32.mrb[13].mxu1 }
 0x10f   :  { %v437_v21 = vadd.f32 %v2301_v48, %v436_v17  ;;  %v1833_v22 = vpop.f32.mrb[14].mxu0  ;;  %1906 = vmatprep.mubr.bf16.mxu1 %v711_v10  ;;  %v565_v23 = vadd.f32 %v2301_v48, %v564_v19  ;;  %v1865_v24 = vpop.f32.mrb[14].mxu1 }
 0x110   :  { %v448_v25 = vadd.f32 %v1833_v22, %v2301_v48  ;;  %v439_v26 = vpop.f32.mrb[15].mxu0  ;;  %1907 = vmatmul.mubr.bf16.gmra.mrb[40].mxu1 %v712_v8  ;;  %v689_v27 = vmax.f32 %v573_v18, 0.0  ;;  %v576_v28 = vadd.f32 %v1865_v24, %v2301_v48  ;;  %v567_v29 = vpop.f32.mrb[15].mxu1  ;;  %v657_v33 = vmax.f32 %v445_v16, 0.0 }
 0x111   :  { %v440_v30 = vadd.f32 %v2301_v48, %v439_v26  ;;  %v687_v31 = vmax.f32 %v565_v23, 0.0  ;;  %v568_v32 = vadd.f32 %v2301_v48, %v567_v29  ;;  %v655_v36 = vmax.f32 %v437_v21, 0.0 }
 0x112   :  { %v658_v34 = vmax.f32 %v448_v25, 0.0  ;;  %v690_v35 = vmax.f32 %v576_v28, 0.0 }
 0x113   :  { %v656_v37 = vmax.f32 %v440_v30, 0.0  ;;  %v688_v38 = vmax.f32 %v568_v32, 0.0 }
 0x114   :  { %v714_v39 = vpack.c.bf16 %v658_v34, %v657_v33  ;;  %v2368_v40 = vpack.c.bf16 %v690_v35, %v689_v27 }
 0x115   :  { %v713_v41 = vpack.c.bf16 %v656_v37, %v655_v36  ;;  %v1836_v43 = vpop.f32.mrb[16].mxu0  ;;  %v2370_v44 = vpack.c.bf16 %v688_v38, %v687_v31  ;;  %v1868_v46 = vpop.f32.mrb[16].mxu1 }
 0x116   :  { %v461_v47 = vadd.f32 %v1836_v43, %v2301_v48  ;;  %v452_v49 = vpop.f32.mrb[17].mxu0  ;;  %v589_v50 = vadd.f32 %v1868_v46, %v2301_v48  ;;  %v580_v51 = vpop.f32.mrb[17].mxu1 }
 0x117   :  { %v453_v52 = vadd.f32 %v2301_v48, %v452_v49  ;;  %v1837_v53 = vpop.f32.mrb[18].mxu0  ;;  %1910 = vmatprep.mubr.bf16.mxu1 %v713_v41  ;;  %v581_v54 = vadd.f32 %v2301_v48, %v580_v51  ;;  %v1869_v55 = vpop.f32.mrb[18].mxu1 }
 0x118   :  { %v464_v56 = vadd.f32 %v1837_v53, %v2301_v48  ;;  %v455_v57 = vpop.f32.mrb[19].mxu0  ;;  %1911 = vmatmul.mubr.bf16.gmra.mrb[44].mxu1 %v714_v39  ;;  %v693_v58 = vmax.f32 %v589_v50, 0.0  ;;  %v592_v59 = vadd.f32 %v1869_v55, %v2301_v48  ;;  %v583_v60 = vpop.f32.mrb[19].mxu1  ;;  %v661_v0 = vmax.f32 %v461_v47, 0.0 }
 0x119   :  { %v456_v61 = vadd.f32 %v2301_v48, %v455_v57  ;;  %v691_v62 = vmax.f32 %v581_v54, 0.0  ;;  %v584_v63 = vadd.f32 %v2301_v48, %v583_v60  ;;  %v659_v3 = vmax.f32 %v453_v52, 0.0 }
 0x11a   :  { %v662_v1 = vmax.f32 %v464_v56, 0.0  ;;  %v694_v2 = vmax.f32 %v592_v59, 0.0 }
 0x11b   :  { %v660_v4 = vmax.f32 %v456_v61, 0.0  ;;  %v692_v5 = vmax.f32 %v584_v63, 0.0 }
 0x11c   :  { %v716_v6 = vpack.c.bf16 %v662_v1, %v661_v0  ;;  %v2380_v7 = vpack.c.bf16 %v694_v2, %v693_v58 }
 0x11d   :  { %v715_v8 = vpack.c.bf16 %v660_v4, %v659_v3  ;;  %v1840_v10 = vpop.f32.mrb[20].mxu0  ;;  %v2382_v11 = vpack.c.bf16 %v692_v5, %v691_v62  ;;  %v1872_v14 = vpop.f32.mrb[20].mxu1 }
 0x11e   :  { %v477_v16 = vadd.f32 %v1840_v10, %v2301_v48  ;;  %v468_v17 = vpop.f32.mrb[21].mxu0  ;;  %v605_v18 = vadd.f32 %v1872_v14, %v2301_v48  ;;  %v596_v19 = vpop.f32.mrb[21].mxu1 }
 0x11f   :  { %v469_v20 = vadd.f32 %v2301_v48, %v468_v17  ;;  %v1841_v21 = vpop.f32.mrb[22].mxu0  ;;  %1914 = vmatprep.mubr.bf16.mxu1 %v715_v8  ;;  %v597_v22 = vadd.f32 %v2301_v48, %v596_v19  ;;  %v1873_v23 = vpop.f32.mrb[22].mxu1 }
 0x120   :  { %v480_v24 = vadd.f32 %v1841_v21, %v2301_v48  ;;  %v471_v25 = vpop.f32.mrb[23].mxu0  ;;  %1915 = vmatmul.mubr.bf16.gmra.mrb[48].mxu1 %v716_v6  ;;  %v697_v26 = vmax.f32 %v605_v18, 0.0  ;;  %v608_v27 = vadd.f32 %v1873_v23, %v2301_v48  ;;  %v599_v28 = vpop.f32.mrb[23].mxu1  ;;  %v665_v32 = vmax.f32 %v477_v16, 0.0 }
 0x121   :  { %v472_v29 = vadd.f32 %v2301_v48, %v471_v25  ;;  %v695_v30 = vmax.f32 %v597_v22, 0.0  ;;  %v600_v31 = vadd.f32 %v2301_v48, %v599_v28  ;;  %v663_v35 = vmax.f32 %v469_v20, 0.0 }
 0x122   :  { %v666_v33 = vmax.f32 %v480_v24, 0.0  ;;  %v698_v34 = vmax.f32 %v608_v27, 0.0 }
 0x123   :  { %v664_v36 = vmax.f32 %v472_v29, 0.0  ;;  %v696_v37 = vmax.f32 %v600_v31, 0.0 }
 0x124   :  { %v718_v38 = vpack.c.bf16 %v666_v33, %v665_v32  ;;  %v2392_v39 = vpack.c.bf16 %v698_v34, %v697_v26 }
 0x125   :  { %v717_v41 = vpack.c.bf16 %v664_v36, %v663_v35  ;;  %v1844_v43 = vpop.f32.mrb[24].mxu0  ;;  %v2394_v46 = vpack.c.bf16 %v696_v37, %v695_v30  ;;  %v1876_v47 = vpop.f32.mrb[24].mxu1 }
 0x126   :  { %v493_v49 = vadd.f32 %v1844_v43, %v2301_v48  ;;  %v484_v50 = vpop.f32.mrb[25].mxu0  ;;  %v621_v51 = vadd.f32 %v1876_v47, %v2301_v48  ;;  %v612_v52 = vpop.f32.mrb[25].mxu1 }
 0x127   :  { %v485_v53 = vadd.f32 %v2301_v48, %v484_v50  ;;  %v1845_v54 = vpop.f32.mrb[26].mxu0  ;;  %1918 = vmatprep.mubr.bf16.mxu1 %v717_v41  ;;  %v613_v55 = vadd.f32 %v2301_v48, %v612_v52  ;;  %v1877_v56 = vpop.f32.mrb[26].mxu1 }
 0x128   :  { %v496_v57 = vadd.f32 %v1845_v54, %v2301_v48  ;;  %v487_v58 = vpop.f32.mrb[27].mxu0  ;;  %1919 = vmatmul.mubr.bf16.gmra.mrb[52].mxu1 %v718_v38  ;;  %v701_v59 = vmax.f32 %v621_v51, 0.0  ;;  %v624_v60 = vadd.f32 %v1877_v56, %v2301_v48  ;;  %v615_v61 = vpop.f32.mrb[27].mxu1  ;;  %v669_v1 = vmax.f32 %v493_v49, 0.0 }
 0x129   :  { %v488_v62 = vadd.f32 %v2301_v48, %v487_v58  ;;  %v699_v63 = vmax.f32 %v613_v55, 0.0  ;;  %v616_v0 = vadd.f32 %v2301_v48, %v615_v61  ;;  %v667_v4 = vmax.f32 %v485_v53, 0.0 }
 0x12a   :  { %v670_v2 = vmax.f32 %v496_v57, 0.0  ;;  %v702_v3 = vmax.f32 %v624_v60, 0.0 }
 0x12b   :  { %v668_v5 = vmax.f32 %v488_v62, 0.0  ;;  %v700_v6 = vmax.f32 %v616_v0, 0.0 }
 0x12c   :  { %v720_v8 = vpack.c.bf16 %v670_v2, %v669_v1  ;;  %v736_v10 = vpack.c.bf16 %v702_v3, %v701_v59 }
 0x12d   :  { %v719_v14 = vpack.c.bf16 %v668_v5, %v667_v4  ;;  %v1848_v16 = vpop.f32.mrb[28].mxu0  ;;  %v735_v17 = vpack.c.bf16 %v700_v6, %v699_v63  ;;  %v1880_v18 = vpop.f32.mrb[28].mxu1 }
 0x12e   :  { %v509_v19 = vadd.f32 %v1848_v16, %v2301_v48  ;;  %v500_v20 = vpop.f32.mrb[29].mxu0  ;;  %v637_v21 = vadd.f32 %v1880_v18, %v2301_v48  ;;  %v628_v22 = vpop.f32.mrb[29].mxu1 }
 0x12f   :  { %v501_v23 = vadd.f32 %v2301_v48, %v500_v20  ;;  %v1849_v24 = vpop.f32.mrb[30].mxu0  ;;  %1922 = vmatprep.mubr.bf16.mxu1 %v719_v14  ;;  %v629_v25 = vadd.f32 %v2301_v48, %v628_v22  ;;  %v1881_v26 = vpop.f32.mrb[30].mxu1 }
 0x130   :  { %v512_v27 = vadd.f32 %v1849_v24, %v2301_v48  ;;  %v503_v28 = vpop.f32.mrb[31].mxu0  ;;  %1923 = vmatmul.mubr.bf16.gmra.mrb[56].mxu1 %v720_v8  ;;  %v705_v29 = vmax.f32 %v637_v21, 0.0  ;;  %v640_v30 = vadd.f32 %v1881_v26, %v2301_v48  ;;  %v631_v31 = vpop.f32.mrb[31].mxu1  ;;  %v673_v35 = vmax.f32 %v509_v19, 0.0 }
 0x131   :  { %v504_v32 = vadd.f32 %v2301_v48, %v503_v28  ;;  %v703_v33 = vmax.f32 %v629_v25, 0.0  ;;  %v632_v34 = vadd.f32 %v2301_v48, %v631_v31  ;;  %v671_v38 = vmax.f32 %v501_v23, 0.0  ;;  %v2113_v48 = vld [vmem:[%s2761_s5 + $0x38] sm:$0xff]  }
 0x132   :  { %v674_v36 = vmax.f32 %v512_v27, 0.0  ;;  %v706_v37 = vmax.f32 %v640_v30, 0.0  ;;  %1976 = vmatprep.subr.bf16.mxu0 %v2113_v48 }
 0x133   :  { %v672_v41 = vmax.f32 %v504_v32, 0.0  ;;  %v704_v43 = vmax.f32 %v632_v34, 0.0  ;;  %1977 = vmatpush3.bf16.msra.mxu0 %v2113_v48 }
 0x134   :  { %v722_v47 = vpack.c.bf16 %v674_v36, %v673_v35  ;;  %v738_v49 = vpack.c.bf16 %v706_v37, %v705_v29 }
 0x135   :  { %v721_v50 = vpack.c.bf16 %v672_v41, %v671_v38  ;;  %v737_v51 = vpack.c.bf16 %v704_v43, %v703_v33 }
 0x137   :  { %1926 = vmatprep.mubr.bf16.mxu1 %v721_v50 }
 0x138   :  { %1927 = vmatmul.mubr.bf16.gmra.mrb[60].mxu1 %v722_v47 }
 0x139   :  { %1930 = vmatprep.mubr.bf16.mxu1 %v2319_v15 }
 0x140   :  { %1931 = vmatmul.mubr.bf16.gmra.mrb[64].mxu1 %v2317_v12  ;;  %v2430_v12 = vld [vmem:[%s2762_s4] ss:$0 sm:$0xff] }
 0x141   :  { %1934 = vmatprep.mubr.bf16.mxu1 %v2337_v45 }
 0x148   :  { %1935 = vmatmul.mubr.bf16.gmra.mrb[68].mxu1 %v2335_v42 }
 0x149   :  { %1938 = vmatprep.mubr.bf16.mxu1 %v2355_v13 }
 0x150   :  { %1939 = vmatmul.mubr.bf16.gmra.mrb[72].mxu1 %v2353_v9 }
 0x151   :  { %1942 = vmatprep.mubr.bf16.mxu1 %v2370_v44 }
 0x158   :  { %1943 = vmatmul.mubr.bf16.gmra.mrb[76].mxu1 %v2368_v40 }
 0x159   :  { %1946 = vmatprep.mubr.bf16.mxu1 %v2382_v11 }
 0x160   :  { %1947 = vmatmul.mubr.bf16.gmra.mrb[80].mxu1 %v2380_v7 }
 0x161   :  { %1950 = vmatprep.mubr.bf16.mxu1 %v2394_v46 }
 0x168   :  { %1951 = vmatmul.mubr.bf16.gmra.mrb[84].mxu1 %v2392_v39 }
 0x169   :  { %1954 = vmatprep.mubr.bf16.mxu1 %v735_v17 }
 0x170   :  { %1955 = vmatmul.mubr.bf16.gmra.mrb[88].mxu1 %v736_v10 }
 0x171   :  { %1958 = vmatprep.mubr.bf16.mxu1 %v737_v51 }
 0x178   :  { %1959 = vmatmul.mubr.bf16.gmra.mrb[92].mxu1 %v738_v49 }
 0x1d3   :  { %v1900_v15 = vpop.f32.mrb[32].mxu1 }
 0x1d4   :  { %v853_v42 = vadd.f32 %v1900_v15, %v2430_v12  ;;  %v844_v45 = vpop.f32.mrb[33].mxu1 }
 0x1d5   :  { %v845_v9 = vadd.f32 %v2430_v12, %v844_v45  ;;  %v1901_v13 = vpop.f32.mrb[34].mxu1 }
 0x1d6   :  { %v856_v40 = vadd.f32 %v1901_v13, %v2430_v12  ;;  %v847_v44 = vpop.f32.mrb[35].mxu1  ;;  %v1101_v11 = vmax.f32 %v853_v42, 0.0 }
 0x1d7   :  { %v848_v7 = vadd.f32 %v2430_v12, %v847_v44  ;;  %v1099_v46 = vmax.f32 %v845_v9, 0.0 }
 0x1d8   :  { %v1102_v39 = vmax.f32 %v856_v40, 0.0 }
 0x1d9   :  { %v1100_v52 = vmax.f32 %v848_v7, 0.0 }
 0x1da   :  { %v1164_v53 = vpack.c.bf16 %v1102_v39, %v1101_v11 }
 0x1db   :  { %v1163_v54 = vpack.c.bf16 %v1100_v52, %v1099_v46  ;;  %v1904_v55 = vpop.f32.mrb[36].mxu1 }
 0x1dc   :  { %v869_v56 = vadd.f32 %v1904_v55, %v2430_v12  ;;  %v860_v57 = vpop.f32.mrb[37].mxu1 }
 0x1dd   :  { %v861_v58 = vadd.f32 %v2430_v12, %v860_v57  ;;  %v1905_v59 = vpop.f32.mrb[38].mxu1  ;;  %1978 = vmatprep.mubr.bf16.mxu0 %v1163_v54 }
 0x1de   :  { %v872_v60 = vadd.f32 %v1905_v59, %v2430_v12  ;;  %v863_v61 = vpop.f32.mrb[39].mxu1  ;;  %1979 = vmatmul.mubr.bf16.vlgmr.msra.gmra.mrb[32].mxu0 %v1164_v53  ;;  %v1105_v63 = vmax.f32 %v869_v56, 0.0 }
 0x1df   :  { %v864_v62 = vadd.f32 %v2430_v12, %v863_v61  ;;  %v1103_v1 = vmax.f32 %v861_v58, 0.0 }
 0x1e0   :  { %v1106_v0 = vmax.f32 %v872_v60, 0.0 }
 0x1e1   :  { %v1104_v2 = vmax.f32 %v864_v62, 0.0 }
 0x1e2   :  { %v1166_v3 = vpack.c.bf16 %v1106_v0, %v1105_v63 }
 0x1e3   :  { %v1165_v4 = vpack.c.bf16 %v1104_v2, %v1103_v1  ;;  %v1908_v5 = vpop.f32.mrb[40].mxu1 }
 0x1e4   :  { %v885_v6 = vadd.f32 %v1908_v5, %v2430_v12  ;;  %v876_v8 = vpop.f32.mrb[41].mxu1 }
 0x1e5   :  { %v877_v10 = vadd.f32 %v2430_v12, %v876_v8  ;;  %v1909_v14 = vpop.f32.mrb[42].mxu1  ;;  %1982 = vmatprep.mubr.bf16.mxu0 %v1165_v4 }
 0x1e6   :  { %v888_v16 = vadd.f32 %v1909_v14, %v2430_v12  ;;  %v879_v17 = vpop.f32.mrb[43].mxu1  ;;  %1983 = vmatmul.mubr.bf16.gmra.mrb[36].mxu0 %v1166_v3  ;;  %v1109_v19 = vmax.f32 %v885_v6, 0.0 }
 0x1e7   :  { %v880_v18 = vadd.f32 %v2430_v12, %v879_v17  ;;  %v1107_v21 = vmax.f32 %v877_v10, 0.0 }
 0x1e8   :  { %v1110_v20 = vmax.f32 %v888_v16, 0.0 }
 0x1e9   :  { %v1108_v22 = vmax.f32 %v880_v18, 0.0 }
 0x1ea   :  { %v1168_v23 = vpack.c.bf16 %v1110_v20, %v1109_v19 }
 0x1eb   :  { %v1167_v24 = vpack.c.bf16 %v1108_v22, %v1107_v21  ;;  %v1912_v25 = vpop.f32.mrb[44].mxu1 }
 0x1ec   :  { %v901_v26 = vadd.f32 %v1912_v25, %v2430_v12  ;;  %v892_v27 = vpop.f32.mrb[45].mxu1 }
 0x1ed   :  { %v893_v28 = vadd.f32 %v2430_v12, %v892_v27  ;;  %v1913_v29 = vpop.f32.mrb[46].mxu1  ;;  %1986 = vmatprep.mubr.bf16.mxu0 %v1167_v24 }
 0x1ee   :  { %v904_v30 = vadd.f32 %v1913_v29, %v2430_v12  ;;  %v895_v31 = vpop.f32.mrb[47].mxu1  ;;  %1987 = vmatmul.mubr.bf16.gmra.mrb[40].mxu0 %v1168_v23  ;;  %v1113_v33 = vmax.f32 %v901_v26, 0.0 }
 0x1ef   :  { %v896_v32 = vadd.f32 %v2430_v12, %v895_v31  ;;  %v1111_v35 = vmax.f32 %v893_v28, 0.0 }
 0x1f0   :  { %v1114_v34 = vmax.f32 %v904_v30, 0.0 }
 0x1f1   :  { %v1112_v36 = vmax.f32 %v896_v32, 0.0 }
 0x1f2   :  { %v1170_v37 = vpack.c.bf16 %v1114_v34, %v1113_v33 }
 0x1f3   :  { %v1169_v38 = vpack.c.bf16 %v1112_v36, %v1111_v35  ;;  %v1916_v41 = vpop.f32.mrb[48].mxu1 }
 0x1f4   :  { %v917_v43 = vadd.f32 %v1916_v41, %v2430_v12  ;;  %v908_v47 = vpop.f32.mrb[49].mxu1 }
 0x1f5   :  { %v909_v49 = vadd.f32 %v2430_v12, %v908_v47  ;;  %v1917_v50 = vpop.f32.mrb[50].mxu1  ;;  %1990 = vmatprep.mubr.bf16.mxu0 %v1169_v38 }
 0x1f6   :  { %v920_v51 = vadd.f32 %v1917_v50, %v2430_v12  ;;  %v911_v48 = vpop.f32.mrb[51].mxu1  ;;  %1991 = vmatmul.mubr.bf16.gmra.mrb[44].mxu0 %v1170_v37  ;;  %v1117_v42 = vmax.f32 %v917_v43, 0.0 }
 0x1f7   :  { %v912_v15 = vadd.f32 %v2430_v12, %v911_v48  ;;  %v1115_v9 = vmax.f32 %v909_v49, 0.0 }
 0x1f8   :  { %v1118_v45 = vmax.f32 %v920_v51, 0.0 }
 0x1f9   :  { %v1116_v13 = vmax.f32 %v912_v15, 0.0 }
 0x1fa   :  { %v1172_v40 = vpack.c.bf16 %v1118_v45, %v1117_v42 }
 0x1fb   :  { %v1171_v44 = vpack.c.bf16 %v1116_v13, %v1115_v9  ;;  %v1920_v7 = vpop.f32.mrb[52].mxu1 }
 0x1fc   :  { %v933_v11 = vadd.f32 %v1920_v7, %v2430_v12  ;;  %v924_v39 = vpop.f32.mrb[53].mxu1 }
 0x1fd   :  { %v925_v46 = vadd.f32 %v2430_v12, %v924_v39  ;;  %v1921_v52 = vpop.f32.mrb[54].mxu1  ;;  %1994 = vmatprep.mubr.bf16.mxu0 %v1171_v44 }
 0x1fe   :  { %v936_v53 = vadd.f32 %v1921_v52, %v2430_v12  ;;  %v927_v54 = vpop.f32.mrb[55].mxu1  ;;  %1995 = vmatmul.mubr.bf16.gmra.mrb[48].mxu0 %v1172_v40  ;;  %v1121_v56 = vmax.f32 %v933_v11, 0.0 }
 0x1ff   :  { %v928_v55 = vadd.f32 %v2430_v12, %v927_v54  ;;  %v1119_v58 = vmax.f32 %v925_v46, 0.0 }
 0x200   :  { %v1122_v57 = vmax.f32 %v936_v53, 0.0 }
 0x201   :  { %v1120_v59 = vmax.f32 %v928_v55, 0.0 }
 0x202   :  { %v1174_v60 = vpack.c.bf16 %v1122_v57, %v1121_v56 }
 0x203   :  { %v1173_v61 = vpack.c.bf16 %v1120_v59, %v1119_v58  ;;  %v1924_v62 = vpop.f32.mrb[56].mxu1 }
 0x204   :  { %v949_v63 = vadd.f32 %v1924_v62, %v2430_v12  ;;  %v940_v0 = vpop.f32.mrb[57].mxu1 }
 0x205   :  { %v941_v1 = vadd.f32 %v2430_v12, %v940_v0  ;;  %v1925_v2 = vpop.f32.mrb[58].mxu1  ;;  %1998 = vmatprep.mubr.bf16.mxu0 %v1173_v61 }
 0x206   :  { %v952_v3 = vadd.f32 %v1925_v2, %v2430_v12  ;;  %v943_v4 = vpop.f32.mrb[59].mxu1  ;;  %1999 = vmatmul.mubr.bf16.gmra.mrb[52].mxu0 %v1174_v60  ;;  %v1125_v6 = vmax.f32 %v949_v63, 0.0 }
 0x207   :  { %v944_v5 = vadd.f32 %v2430_v12, %v943_v4  ;;  %v1123_v10 = vmax.f32 %v941_v1, 0.0 }
 0x208   :  { %v1126_v8 = vmax.f32 %v952_v3, 0.0 }
 0x209   :  { %v1124_v14 = vmax.f32 %v944_v5, 0.0 }
 0x20a   :  { %v1176_v16 = vpack.c.bf16 %v1126_v8, %v1125_v6 }
 0x20b   :  { %v1175_v17 = vpack.c.bf16 %v1124_v14, %v1123_v10  ;;  %v1928_v18 = vpop.f32.mrb[60].mxu1 }
 0x20c   :  { %v965_v19 = vadd.f32 %v1928_v18, %v2430_v12  ;;  %v956_v20 = vpop.f32.mrb[61].mxu1 }
 0x20d   :  { %v957_v21 = vadd.f32 %v2430_v12, %v956_v20  ;;  %v1929_v22 = vpop.f32.mrb[62].mxu1  ;;  %2002 = vmatprep.mubr.bf16.mxu0 %v1175_v17 }
 0x20e   :  { %v968_v23 = vadd.f32 %v1929_v22, %v2430_v12  ;;  %v959_v24 = vpop.f32.mrb[63].mxu1  ;;  %2003 = vmatmul.mubr.bf16.gmra.mrb[56].mxu0 %v1176_v16  ;;  %v1129_v26 = vmax.f32 %v965_v19, 0.0 }
 0x20f   :  { %v960_v25 = vadd.f32 %v2430_v12, %v959_v24  ;;  %v1127_v28 = vmax.f32 %v957_v21, 0.0 }
 0x210   :  { %v1130_v27 = vmax.f32 %v968_v23, 0.0 }
 0x211   :  { %v1128_v29 = vmax.f32 %v960_v25, 0.0 }
 0x212   :  { %v1178_v30 = vpack.c.bf16 %v1130_v27, %v1129_v26 }
 0x213   :  { %v1177_v31 = vpack.c.bf16 %v1128_v29, %v1127_v28  ;;  %v1932_v32 = vpop.f32.mrb[64].mxu1 }
 0x214   :  { %v981_v33 = vadd.f32 %v1932_v32, %v2430_v12  ;;  %v972_v34 = vpop.f32.mrb[65].mxu1 }
 0x215   :  { %v973_v35 = vadd.f32 %v2430_v12, %v972_v34  ;;  %v1933_v36 = vpop.f32.mrb[66].mxu1  ;;  %2006 = vmatprep.mubr.bf16.mxu0 %v1177_v31 }
 0x216   :  { %v984_v37 = vadd.f32 %v1933_v36, %v2430_v12  ;;  %v975_v38 = vpop.f32.mrb[67].mxu1  ;;  %2007 = vmatmul.mubr.bf16.gmra.mrb[60].mxu0 %v1178_v30  ;;  %v1133_v43 = vmax.f32 %v981_v33, 0.0 }
 0x217   :  { %v976_v41 = vadd.f32 %v2430_v12, %v975_v38  ;;  %v1131_v49 = vmax.f32 %v973_v35, 0.0 }
 0x218   :  { %v1134_v47 = vmax.f32 %v984_v37, 0.0 }
 0x219   :  { %v1132_v50 = vmax.f32 %v976_v41, 0.0 }
 0x21a   :  { %v1180_v51 = vpack.c.bf16 %v1134_v47, %v1133_v43 }
 0x21b   :  { %v1179_v48 = vpack.c.bf16 %v1132_v50, %v1131_v49  ;;  %v1936_v15 = vpop.f32.mrb[68].mxu1 }
 0x21c   :  { %v997_v42 = vadd.f32 %v1936_v15, %v2430_v12  ;;  %v988_v45 = vpop.f32.mrb[69].mxu1 }
 0x21d   :  { %v989_v9 = vadd.f32 %v2430_v12, %v988_v45  ;;  %v1937_v13 = vpop.f32.mrb[70].mxu1  ;;  %2010 = vmatprep.mubr.bf16.mxu0 %v1179_v48 }
 0x21e   :  { %v1000_v40 = vadd.f32 %v1937_v13, %v2430_v12  ;;  %v991_v44 = vpop.f32.mrb[71].mxu1  ;;  %2011 = vmatmul.mubr.bf16.gmra.mrb[64].mxu0 %v1180_v51  ;;  %v1137_v11 = vmax.f32 %v997_v42, 0.0 }
 0x21f   :  { %v992_v7 = vadd.f32 %v2430_v12, %v991_v44  ;;  %v1135_v46 = vmax.f32 %v989_v9, 0.0 }
 0x220   :  { %v1138_v39 = vmax.f32 %v1000_v40, 0.0 }
 0x221   :  { %v1136_v52 = vmax.f32 %v992_v7, 0.0 }
 0x222   :  { %v1182_v53 = vpack.c.bf16 %v1138_v39, %v1137_v11 }
 0x223   :  { %v1181_v54 = vpack.c.bf16 %v1136_v52, %v1135_v46  ;;  %v1940_v55 = vpop.f32.mrb[72].mxu1 }
 0x224   :  { %v1013_v56 = vadd.f32 %v1940_v55, %v2430_v12  ;;  %v1004_v57 = vpop.f32.mrb[73].mxu1 }
 0x225   :  { %v1005_v58 = vadd.f32 %v2430_v12, %v1004_v57  ;;  %v1941_v59 = vpop.f32.mrb[74].mxu1  ;;  %2014 = vmatprep.mubr.bf16.mxu0 %v1181_v54 }
 0x226   :  { %v1016_v60 = vadd.f32 %v1941_v59, %v2430_v12  ;;  %v1007_v61 = vpop.f32.mrb[75].mxu1  ;;  %2015 = vmatmul.mubr.bf16.gmra.mrb[68].mxu0 %v1182_v53  ;;  %v1141_v63 = vmax.f32 %v1013_v56, 0.0 }
 0x227   :  { %v1008_v62 = vadd.f32 %v2430_v12, %v1007_v61  ;;  %v1139_v1 = vmax.f32 %v1005_v58, 0.0 }
 0x228   :  { %v1142_v0 = vmax.f32 %v1016_v60, 0.0 }
 0x229   :  { %v1140_v2 = vmax.f32 %v1008_v62, 0.0 }
 0x22a   :  { %v1184_v3 = vpack.c.bf16 %v1142_v0, %v1141_v63 }
 0x22b   :  { %v1183_v4 = vpack.c.bf16 %v1140_v2, %v1139_v1  ;;  %v1944_v5 = vpop.f32.mrb[76].mxu1 }
 0x22c   :  { %v1029_v6 = vadd.f32 %v1944_v5, %v2430_v12  ;;  %v1020_v8 = vpop.f32.mrb[77].mxu1 }
 0x22d   :  { %v1021_v10 = vadd.f32 %v2430_v12, %v1020_v8  ;;  %v1945_v14 = vpop.f32.mrb[78].mxu1  ;;  %2018 = vmatprep.mubr.bf16.mxu0 %v1183_v4 }
 0x22e   :  { %v1032_v16 = vadd.f32 %v1945_v14, %v2430_v12  ;;  %v1023_v17 = vpop.f32.mrb[79].mxu1  ;;  %2019 = vmatmul.mubr.bf16.gmra.mrb[72].mxu0 %v1184_v3  ;;  %v1145_v19 = vmax.f32 %v1029_v6, 0.0 }
 0x22f   :  { %v1024_v18 = vadd.f32 %v2430_v12, %v1023_v17  ;;  %v1143_v21 = vmax.f32 %v1021_v10, 0.0 }
 0x230   :  { %v1146_v20 = vmax.f32 %v1032_v16, 0.0 }
 0x231   :  { %v1144_v22 = vmax.f32 %v1024_v18, 0.0  ;;  %v2499_v18 = vld [vmem:[%s2763_s6] ss:$0 sm:$0xff] }
 0x232   :  { %v1186_v23 = vpack.c.bf16 %v1146_v20, %v1145_v19 }
 0x233   :  { %v1185_v24 = vpack.c.bf16 %v1144_v22, %v1143_v21  ;;  %v1948_v25 = vpop.f32.mrb[80].mxu1 }
 0x234   :  { %v1045_v26 = vadd.f32 %v1948_v25, %v2430_v12  ;;  %v1036_v27 = vpop.f32.mrb[81].mxu1 }
 0x235   :  { %v1037_v28 = vadd.f32 %v2430_v12, %v1036_v27  ;;  %v1949_v29 = vpop.f32.mrb[82].mxu1  ;;  %2022 = vmatprep.mubr.bf16.mxu0 %v1185_v24 }
 0x236   :  { %v1048_v30 = vadd.f32 %v1949_v29, %v2430_v12  ;;  %v1039_v31 = vpop.f32.mrb[83].mxu1  ;;  %2023 = vmatmul.mubr.bf16.gmra.mrb[76].mxu0 %v1186_v23  ;;  %v1149_v33 = vmax.f32 %v1045_v26, 0.0 }
 0x237   :  { %v1040_v32 = vadd.f32 %v2430_v12, %v1039_v31  ;;  %v1147_v35 = vmax.f32 %v1037_v28, 0.0 }
 0x238   :  { %v1150_v34 = vmax.f32 %v1048_v30, 0.0 }
 0x239   :  { %v1148_v36 = vmax.f32 %v1040_v32, 0.0 }
 0x23a   :  { %v1188_v37 = vpack.c.bf16 %v1150_v34, %v1149_v33 }
 0x23b   :  { %v1187_v38 = vpack.c.bf16 %v1148_v36, %v1147_v35  ;;  %v1952_v41 = vpop.f32.mrb[84].mxu1 }
 0x23c   :  { %v1061_v43 = vadd.f32 %v1952_v41, %v2430_v12  ;;  %v1052_v47 = vpop.f32.mrb[85].mxu1 }
 0x23d   :  { %v1053_v49 = vadd.f32 %v2430_v12, %v1052_v47  ;;  %v1953_v50 = vpop.f32.mrb[86].mxu1  ;;  %2026 = vmatprep.mubr.bf16.mxu0 %v1187_v38 }
 0x23e   :  { %v1064_v51 = vadd.f32 %v1953_v50, %v2430_v12  ;;  %v1055_v48 = vpop.f32.mrb[87].mxu1  ;;  %2027 = vmatmul.mubr.bf16.gmra.mrb[80].mxu0 %v1188_v37  ;;  %v1153_v42 = vmax.f32 %v1061_v43, 0.0 }
 0x23f   :  { %v1056_v15 = vadd.f32 %v2430_v12, %v1055_v48  ;;  %v1151_v9 = vmax.f32 %v1053_v49, 0.0 }
 0x240   :  { %v1154_v45 = vmax.f32 %v1064_v51, 0.0 }
 0x241   :  { %v1152_v13 = vmax.f32 %v1056_v15, 0.0 }
 0x242   :  { %v1190_v40 = vpack.c.bf16 %v1154_v45, %v1153_v42 }
 0x243   :  { %v1189_v44 = vpack.c.bf16 %v1152_v13, %v1151_v9  ;;  %v1956_v7 = vpop.f32.mrb[88].mxu1 }
 0x244   :  { %v1077_v11 = vadd.f32 %v1956_v7, %v2430_v12  ;;  %v1068_v39 = vpop.f32.mrb[89].mxu1 }
 0x245   :  { %v1069_v46 = vadd.f32 %v2430_v12, %v1068_v39  ;;  %v1957_v52 = vpop.f32.mrb[90].mxu1  ;;  %2030 = vmatprep.mubr.bf16.mxu0 %v1189_v44 }
 0x246   :  { %v1080_v53 = vadd.f32 %v1957_v52, %v2430_v12  ;;  %v1071_v54 = vpop.f32.mrb[91].mxu1  ;;  %2031 = vmatmul.mubr.bf16.gmra.mrb[84].mxu0 %v1190_v40  ;;  %v1157_v56 = vmax.f32 %v1077_v11, 0.0 }
 0x247   :  { %v1072_v55 = vadd.f32 %v2430_v12, %v1071_v54  ;;  %v1155_v58 = vmax.f32 %v1069_v46, 0.0 }
 0x248   :  { %v1158_v57 = vmax.f32 %v1080_v53, 0.0 }
 0x249   :  { %v1156_v59 = vmax.f32 %v1072_v55, 0.0 }
 0x24a   :  { %v1192_v60 = vpack.c.bf16 %v1158_v57, %v1157_v56 }
 0x24b   :  { %v1191_v61 = vpack.c.bf16 %v1156_v59, %v1155_v58  ;;  %v1960_v62 = vpop.f32.mrb[92].mxu1 }
 0x24c   :  { %v1093_v63 = vadd.f32 %v1960_v62, %v2430_v12  ;;  %v1084_v0 = vpop.f32.mrb[93].mxu1 }
 0x24d   :  { %v1085_v1 = vadd.f32 %v2430_v12, %v1084_v0  ;;  %v1961_v2 = vpop.f32.mrb[94].mxu1  ;;  %2034 = vmatprep.mubr.bf16.mxu0 %v1191_v61 }
 0x24e   :  { %v1096_v3 = vadd.f32 %v1961_v2, %v2430_v12  ;;  %v1087_v4 = vpop.f32.mrb[95].mxu1  ;;  %2035 = vmatmul.mubr.bf16.gmra.mrb[88].mxu0 %v1192_v60  ;;  %v1161_v6 = vmax.f32 %v1093_v63, 0.0 }
 0x24f   :  { %v1088_v5 = vadd.f32 %v2430_v12, %v1087_v4  ;;  %v1159_v10 = vmax.f32 %v1085_v1, 0.0 }
 0x250   :  { %v1162_v8 = vmax.f32 %v1096_v3, 0.0 }
 0x251   :  { %v1160_v14 = vmax.f32 %v1088_v5, 0.0 }
 0x252   :  { %v1194_v16 = vpack.c.bf16 %v1162_v8, %v1161_v6 }
 0x253   :  { %v1193_v17 = vpack.c.bf16 %v1160_v14, %v1159_v10 }
 0x255   :  { %2038 = vmatprep.mubr.bf16.mxu0 %v1193_v17 }
 0x256   :  { %2039 = vmatmul.mubr.bf16.gmra.mrb[92].mxu0 %v1194_v16 }
 0x2b1   :  { %v1980_v19 = vpop.f32.mrb[32].mxu0 }
 0x2b2   :  { %v1309_v20 = vadd.f32 %v1980_v19, %v2499_v18  ;;  %v1300_v21 = vpop.f32.mrb[33].mxu0 }
 0x2b3   :  { %v1301_v22 = vadd.f32 %v2499_v18, %v1300_v21  ;;  %v1981_v12 = vpop.f32.mrb[34].mxu0 }
 0x2b4   :  { %1557 = vst [vmem:[%s2764_s7 + $0x10] sm:$0xff] %v1309_v20  ;;  %v1312_v23 = vadd.f32 %v1981_v12, %v2499_v18  ;;  %v1303_v24 = vpop.f32.mrb[35].mxu0 }
 0x2b5   :  { %1555 = vst [vmem:[%s2764_s7] sm:$0xff] %v1301_v22  ;;  %v1304_v25 = vadd.f32 %v2499_v18, %v1303_v24 }
 0x2b6   :  { %1558 = vst [vmem:[%s2764_s7 + $0x18] sm:$0xff] %v1312_v23 }
 0x2b7   :  { %1556 = vst [vmem:[%s2764_s7 + $0x8] sm:$0xff] %v1304_v25 }
 0x2b9   :  { %v1984_v26 = vpop.f32.mrb[36].mxu0 }
 0x2ba   :  { %v1325_v27 = vadd.f32 %v1984_v26, %v2499_v18  ;;  %v1316_v28 = vpop.f32.mrb[37].mxu0 }
 0x2bb   :  { %v1317_v29 = vadd.f32 %v2499_v18, %v1316_v28  ;;  %v1985_v30 = vpop.f32.mrb[38].mxu0 }
 0x2bc   :  { %1561 = vst [vmem:[%s2764_s7 + $0x30] sm:$0xff] %v1325_v27  ;;  %v1328_v31 = vadd.f32 %v1985_v30, %v2499_v18  ;;  %v1319_v32 = vpop.f32.mrb[39].mxu0 }
 0x2bd   :  { %1559 = vst [vmem:[%s2764_s7 + $0x20] sm:$0xff] %v1317_v29  ;;  %v1320_v33 = vadd.f32 %v2499_v18, %v1319_v32 }
 0x2be   :  { %1562 = vst [vmem:[%s2764_s7 + $0x38] sm:$0xff] %v1328_v31 }
 0x2bf   :  { %1560 = vst [vmem:[%s2764_s7 + $0x28] sm:$0xff] %v1320_v33 }
 0x2c1   :  { %v1988_v34 = vpop.f32.mrb[40].mxu0 }
 0x2c2   :  { %v1341_v35 = vadd.f32 %v1988_v34, %v2499_v18  ;;  %v1332_v36 = vpop.f32.mrb[41].mxu0 }
 0x2c3   :  { %v1333_v37 = vadd.f32 %v2499_v18, %v1332_v36  ;;  %v1989_v38 = vpop.f32.mrb[42].mxu0 }
 0x2c4   :  { %1565 = vst [vmem:[%s2764_s7 + $0x50] sm:$0xff] %v1341_v35  ;;  %v1344_v41 = vadd.f32 %v1989_v38, %v2499_v18  ;;  %v1335_v43 = vpop.f32.mrb[43].mxu0 }
 0x2c5   :  { %1563 = vst [vmem:[%s2764_s7 + $0x40] sm:$0xff] %v1333_v37  ;;  %v1336_v47 = vadd.f32 %v2499_v18, %v1335_v43 }
 0x2c6   :  { %1566 = vst [vmem:[%s2764_s7 + $0x58] sm:$0xff] %v1344_v41 }
 0x2c7   :  { %1564 = vst [vmem:[%s2764_s7 + $0x48] sm:$0xff] %v1336_v47 }
 0x2c9   :  { %v1992_v49 = vpop.f32.mrb[44].mxu0 }
 0x2ca   :  { %v1357_v50 = vadd.f32 %v1992_v49, %v2499_v18  ;;  %v1348_v51 = vpop.f32.mrb[45].mxu0 }
 0x2cb   :  { %v1349_v48 = vadd.f32 %v2499_v18, %v1348_v51  ;;  %v1993_v15 = vpop.f32.mrb[46].mxu0 }
 0x2cc   :  { %1569 = vst [vmem:[%s2764_s7 + $0x70] sm:$0xff] %v1357_v50  ;;  %v1360_v42 = vadd.f32 %v1993_v15, %v2499_v18  ;;  %v1351_v45 = vpop.f32.mrb[47].mxu0 }
 0x2cd   :  { %1567 = vst [vmem:[%s2764_s7 + $0x60] sm:$0xff] %v1349_v48  ;;  %v1352_v9 = vadd.f32 %v2499_v18, %v1351_v45 }
 0x2ce   :  { %1570 = vst [vmem:[%s2764_s7 + $0x78] sm:$0xff] %v1360_v42 }
 0x2cf   :  { %1568 = vst [vmem:[%s2764_s7 + $0x68] sm:$0xff] %v1352_v9 }
 0x2d1   :  { %v1996_v13 = vpop.f32.mrb[48].mxu0 }
 0x2d2   :  { %v1373_v40 = vadd.f32 %v1996_v13, %v2499_v18  ;;  %v1364_v44 = vpop.f32.mrb[49].mxu0 }
 0x2d3   :  { %v1365_v7 = vadd.f32 %v2499_v18, %v1364_v44  ;;  %v1997_v11 = vpop.f32.mrb[50].mxu0 }
 0x2d4   :  { %1573 = vst [vmem:[%s2764_s7 + $0x90] sm:$0xff] %v1373_v40  ;;  %v1376_v39 = vadd.f32 %v1997_v11, %v2499_v18  ;;  %v1367_v46 = vpop.f32.mrb[51].mxu0 }
 0x2d5   :  { %1571 = vst [vmem:[%s2764_s7 + $0x80] sm:$0xff] %v1365_v7  ;;  %v1368_v52 = vadd.f32 %v2499_v18, %v1367_v46 }
 0x2d6   :  { %1574 = vst [vmem:[%s2764_s7 + $0x98] sm:$0xff] %v1376_v39 }
 0x2d7   :  { %1572 = vst [vmem:[%s2764_s7 + $0x88] sm:$0xff] %v1368_v52 }
 0x2d9   :  { %v2000_v53 = vpop.f32.mrb[52].mxu0 }
 0x2da   :  { %v1389_v54 = vadd.f32 %v2000_v53, %v2499_v18  ;;  %v1380_v55 = vpop.f32.mrb[53].mxu0 }
 0x2db   :  { %v1381_v56 = vadd.f32 %v2499_v18, %v1380_v55  ;;  %v2001_v57 = vpop.f32.mrb[54].mxu0 }
 0x2dc   :  { %1577 = vst [vmem:[%s2764_s7 + $0xb0] sm:$0xff] %v1389_v54  ;;  %v1392_v58 = vadd.f32 %v2001_v57, %v2499_v18  ;;  %v1383_v59 = vpop.f32.mrb[55].mxu0 }
 0x2dd   :  { %1575 = vst [vmem:[%s2764_s7 + $0xa0] sm:$0xff] %v1381_v56  ;;  %v1384_v60 = vadd.f32 %v2499_v18, %v1383_v59 }
 0x2de   :  { %1578 = vst [vmem:[%s2764_s7 + $0xb8] sm:$0xff] %v1392_v58 }
 0x2df   :  { %1576 = vst [vmem:[%s2764_s7 + $0xa8] sm:$0xff] %v1384_v60 }
 0x2e1   :  { %v2004_v61 = vpop.f32.mrb[56].mxu0 }
 0x2e2   :  { %v1405_v62 = vadd.f32 %v2004_v61, %v2499_v18  ;;  %v1396_v63 = vpop.f32.mrb[57].mxu0 }
 0x2e3   :  { %v1397_v0 = vadd.f32 %v2499_v18, %v1396_v63  ;;  %v2005_v1 = vpop.f32.mrb[58].mxu0 }
 0x2e4   :  { %1581 = vst [vmem:[%s2764_s7 + $0xd0] sm:$0xff] %v1405_v62  ;;  %v1408_v2 = vadd.f32 %v2005_v1, %v2499_v18  ;;  %v1399_v3 = vpop.f32.mrb[59].mxu0 }
 0x2e5   :  { %1579 = vst [vmem:[%s2764_s7 + $0xc0] sm:$0xff] %v1397_v0  ;;  %v1400_v4 = vadd.f32 %v2499_v18, %v1399_v3 }
 0x2e6   :  { %1582 = vst [vmem:[%s2764_s7 + $0xd8] sm:$0xff] %v1408_v2 }
 0x2e7   :  { %1580 = vst [vmem:[%s2764_s7 + $0xc8] sm:$0xff] %v1400_v4 }
 0x2e9   :  { %v2008_v5 = vpop.f32.mrb[60].mxu0 }
 0x2ea   :  { %v1421_v6 = vadd.f32 %v2008_v5, %v2499_v18  ;;  %v1412_v8 = vpop.f32.mrb[61].mxu0 }
 0x2eb   :  { %v1413_v10 = vadd.f32 %v2499_v18, %v1412_v8  ;;  %v2009_v14 = vpop.f32.mrb[62].mxu0 }
 0x2ec   :  { %1585 = vst [vmem:[%s2764_s7 + $0xf0] sm:$0xff] %v1421_v6  ;;  %v1424_v16 = vadd.f32 %v2009_v14, %v2499_v18  ;;  %v1415_v17 = vpop.f32.mrb[63].mxu0 }
 0x2ed   :  { %1583 = vst [vmem:[%s2764_s7 + $0xe0] sm:$0xff] %v1413_v10  ;;  %v1416_v19 = vadd.f32 %v2499_v18, %v1415_v17 }
 0x2ee   :  { %1586 = vst [vmem:[%s2764_s7 + $0xf8] sm:$0xff] %v1424_v16 }
 0x2ef   :  { %1584 = vst [vmem:[%s2764_s7 + $0xe8] sm:$0xff] %v1416_v19 }
 0x2f1   :  { %v2012_v20 = vpop.f32.mrb[64].mxu0 }
 0x2f2   :  { %v1437_v21 = vadd.f32 %v2012_v20, %v2499_v18  ;;  %v1428_v22 = vpop.f32.mrb[65].mxu0 }
 0x2f3   :  { %v1429_v12 = vadd.f32 %v2499_v18, %v1428_v22  ;;  %v2013_v23 = vpop.f32.mrb[66].mxu0 }
 0x2f4   :  { %1589 = vst [vmem:[%s2764_s7 + $0x110] sm:$0xff] %v1437_v21  ;;  %v1440_v24 = vadd.f32 %v2013_v23, %v2499_v18  ;;  %v1431_v25 = vpop.f32.mrb[67].mxu0 }
 0x2f5   :  { %1587 = vst [vmem:[%s2764_s7 + $0x100] sm:$0xff] %v1429_v12  ;;  %v1432_v26 = vadd.f32 %v2499_v18, %v1431_v25 }
 0x2f6   :  { %1590 = vst [vmem:[%s2764_s7 + $0x118] sm:$0xff] %v1440_v24 }
 0x2f7   :  { %1588 = vst [vmem:[%s2764_s7 + $0x108] sm:$0xff] %v1432_v26 }
 0x2f9   :  { %v2016_v27 = vpop.f32.mrb[68].mxu0 }
 0x2fa   :  { %v1453_v28 = vadd.f32 %v2016_v27, %v2499_v18  ;;  %v1444_v29 = vpop.f32.mrb[69].mxu0 }
 0x2fb   :  { %v1445_v30 = vadd.f32 %v2499_v18, %v1444_v29  ;;  %v2017_v31 = vpop.f32.mrb[70].mxu0 }
 0x2fc   :  { %1593 = vst [vmem:[%s2764_s7 + $0x130] sm:$0xff] %v1453_v28  ;;  %v1456_v32 = vadd.f32 %v2017_v31, %v2499_v18  ;;  %v1447_v33 = vpop.f32.mrb[71].mxu0 }
 0x2fd   :  { %1591 = vst [vmem:[%s2764_s7 + $0x120] sm:$0xff] %v1445_v30  ;;  %v1448_v34 = vadd.f32 %v2499_v18, %v1447_v33 }
 0x2fe   :  { %1594 = vst [vmem:[%s2764_s7 + $0x138] sm:$0xff] %v1456_v32 }
 0x2ff   :  { %1592 = vst [vmem:[%s2764_s7 + $0x128] sm:$0xff] %v1448_v34 }
 0x301   :  { %v2020_v35 = vpop.f32.mrb[72].mxu0 }
 0x302   :  { %v1469_v36 = vadd.f32 %v2020_v35, %v2499_v18  ;;  %v1460_v37 = vpop.f32.mrb[73].mxu0 }
 0x303   :  { %v1461_v38 = vadd.f32 %v2499_v18, %v1460_v37  ;;  %v2021_v41 = vpop.f32.mrb[74].mxu0 }
 0x304   :  { %1597 = vst [vmem:[%s2764_s7 + $0x150] sm:$0xff] %v1469_v36  ;;  %v1472_v43 = vadd.f32 %v2021_v41, %v2499_v18  ;;  %v1463_v47 = vpop.f32.mrb[75].mxu0 }
 0x305   :  { %1595 = vst [vmem:[%s2764_s7 + $0x140] sm:$0xff] %v1461_v38  ;;  %v1464_v49 = vadd.f32 %v2499_v18, %v1463_v47 }
 0x306   :  { %1598 = vst [vmem:[%s2764_s7 + $0x158] sm:$0xff] %v1472_v43 }
 0x307   :  { %1596 = vst [vmem:[%s2764_s7 + $0x148] sm:$0xff] %v1464_v49 }
 0x309   :  { %v2024_v50 = vpop.f32.mrb[76].mxu0 }
 0x30a   :  { %v1485_v51 = vadd.f32 %v2024_v50, %v2499_v18  ;;  %v1476_v48 = vpop.f32.mrb[77].mxu0 }
 0x30b   :  { %v1477_v15 = vadd.f32 %v2499_v18, %v1476_v48  ;;  %v2025_v42 = vpop.f32.mrb[78].mxu0 }
 0x30c   :  { %1601 = vst [vmem:[%s2764_s7 + $0x170] sm:$0xff] %v1485_v51  ;;  %v1488_v45 = vadd.f32 %v2025_v42, %v2499_v18  ;;  %v1479_v9 = vpop.f32.mrb[79].mxu0 }
 0x30d   :  { %1599 = vst [vmem:[%s2764_s7 + $0x160] sm:$0xff] %v1477_v15  ;;  %v1480_v13 = vadd.f32 %v2499_v18, %v1479_v9 }
 0x30e   :  { %1602 = vst [vmem:[%s2764_s7 + $0x178] sm:$0xff] %v1488_v45 }
 0x30f   :  { %1600 = vst [vmem:[%s2764_s7 + $0x168] sm:$0xff] %v1480_v13 }
 0x311   :  { %v2028_v40 = vpop.f32.mrb[80].mxu0 }
 0x312   :  { %v1501_v44 = vadd.f32 %v2028_v40, %v2499_v18  ;;  %v1492_v7 = vpop.f32.mrb[81].mxu0 }
 0x313   :  { %v1493_v11 = vadd.f32 %v2499_v18, %v1492_v7  ;;  %v2029_v39 = vpop.f32.mrb[82].mxu0 }
 0x314   :  { %1605 = vst [vmem:[%s2764_s7 + $0x190] sm:$0xff] %v1501_v44  ;;  %v1504_v46 = vadd.f32 %v2029_v39, %v2499_v18  ;;  %v1495_v52 = vpop.f32.mrb[83].mxu0 }
 0x315   :  { %1603 = vst [vmem:[%s2764_s7 + $0x180] sm:$0xff] %v1493_v11  ;;  %v1496_v53 = vadd.f32 %v2499_v18, %v1495_v52 }
 0x316   :  { %1606 = vst [vmem:[%s2764_s7 + $0x198] sm:$0xff] %v1504_v46 }
 0x317   :  { %1604 = vst [vmem:[%s2764_s7 + $0x188] sm:$0xff] %v1496_v53 }
 0x319   :  { %v2032_v54 = vpop.f32.mrb[84].mxu0 }
 0x31a   :  { %v1517_v55 = vadd.f32 %v2032_v54, %v2499_v18  ;;  %v1508_v56 = vpop.f32.mrb[85].mxu0 }
 0x31b   :  { %v1509_v57 = vadd.f32 %v2499_v18, %v1508_v56  ;;  %v2033_v58 = vpop.f32.mrb[86].mxu0 }
 0x31c   :  { %1609 = vst [vmem:[%s2764_s7 + $0x1b0] sm:$0xff] %v1517_v55  ;;  %v1520_v59 = vadd.f32 %v2033_v58, %v2499_v18  ;;  %v1511_v60 = vpop.f32.mrb[87].mxu0 }
 0x31d   :  { %1607 = vst [vmem:[%s2764_s7 + $0x1a0] sm:$0xff] %v1509_v57  ;;  %v1512_v61 = vadd.f32 %v2499_v18, %v1511_v60 }
 0x31e   :  { %1610 = vst [vmem:[%s2764_s7 + $0x1b8] sm:$0xff] %v1520_v59 }
 0x31f   :  { %1608 = vst [vmem:[%s2764_s7 + $0x1a8] sm:$0xff] %v1512_v61 }
 0x321   :  { %v2036_v62 = vpop.f32.mrb[88].mxu0 }
 0x322   :  { %v1533_v63 = vadd.f32 %v2036_v62, %v2499_v18  ;;  %v1524_v0 = vpop.f32.mrb[89].mxu0 }
 0x323   :  { %v1525_v1 = vadd.f32 %v2499_v18, %v1524_v0  ;;  %v2037_v2 = vpop.f32.mrb[90].mxu0 }
 0x324   :  { %1613 = vst [vmem:[%s2764_s7 + $0x1d0] sm:$0xff] %v1533_v63  ;;  %v1536_v3 = vadd.f32 %v2037_v2, %v2499_v18  ;;  %v1527_v4 = vpop.f32.mrb[91].mxu0 }
 0x325   :  { %1611 = vst [vmem:[%s2764_s7 + $0x1c0] sm:$0xff] %v1525_v1  ;;  %v1528_v5 = vadd.f32 %v2499_v18, %v1527_v4 }
 0x326   :  { %1614 = vst [vmem:[%s2764_s7 + $0x1d8] sm:$0xff] %v1536_v3 }
 0x327   :  { %1612 = vst [vmem:[%s2764_s7 + $0x1c8] sm:$0xff] %v1528_v5 }
 0x329   :  { %v2040_v6 = vpop.f32.mrb[92].mxu0 }
 0x32a   :  { %v1549_v8 = vadd.f32 %v2040_v6, %v2499_v18  ;;  %v1540_v10 = vpop.f32.mrb[93].mxu0 }
 0x32b   :  { %v1541_v14 = vadd.f32 %v2499_v18, %v1540_v10  ;;  %v2041_v16 = vpop.f32.mrb[94].mxu0 }
 0x32c   :  { %1617 = vst [vmem:[%s2764_s7 + $0x1f0] sm:$0xff] %v1549_v8  ;;  %v1552_v17 = vadd.f32 %v2041_v16, %v2499_v18  ;;  %v1543_v19 = vpop.f32.mrb[95].mxu0 }
 0x32d   :  { %1615 = vst [vmem:[%s2764_s7 + $0x1e0] sm:$0xff] %v1541_v14  ;;  %v1544_v20 = vadd.f32 %v2499_v18, %v1543_v19 }
 0x32e   :  { %1618 = vst [vmem:[%s2764_s7 + $0x1f8] sm:$0xff] %v1552_v17 }
 0x32f   :  { %1616 = vst [vmem:[%s2764_s7 + $0x1e8] sm:$0xff] %v1544_v20 }

</bundles_post_ra>
